<compile_context>
chip_gen: v7x
topology: tpu7x:2x2x1
jax: 0.10.0
libtpu: 0.0.40
codegen_flags: <defaults>
</compile_context>

<pallas_src>
import math

import jax
import jax.numpy as jnp
from jax.experimental import pallas as pl
from jax.experimental.pallas import tpu as pltpu


# --------------------------------------------------------------------------- #
# Fused MLP kernel (channel-major):
#   o = W2 @ relu(W1 @ x + b1) + b2      for one (Cin, tn) pixel-column tile
# --------------------------------------------------------------------------- #
def _mlp_kernel(x_ref, w1_ref, b1_ref, w2_ref, b2_ref, o_ref):
    x = x_ref[...]                                                  # (Cin, tn) bf16
    h = jnp.dot(w1_ref[...], x, preferred_element_type=jnp.float32)  # (Hf, tn) f32
    h = jnp.maximum(h + b1_ref[...], 0.0)                           # fc1 + ReLU (f32)
    # TODO(synk): nn.Dropout in training mode is stochastic; identity here (eval).
    h = h.astype(w2_ref.dtype)                                      # bf16 for 2nd MXU pass
    y = jnp.dot(w2_ref[...], h, preferred_element_type=jnp.float32)  # (Cout, tn) f32
    o_ref[...] = (y + b2_ref[...]).astype(o_ref.dtype)              # fc2 + bias


def mlp_flat_pallas(xf, w1, b1, w2, b2, *, batch, out_dtype, tn=512):
    """xf: (batch*Cin, S) channel-major pixels; w1: (Hf, Cin); w2: (Cout, Hf).

    Returns (batch*Cout, S) in `out_dtype` (reshapes straight back to NCHW)."""
    BC, S = xf.shape
    Cin = BC // batch
    Hf = w1.shape[0]
    Cout = w2.shape[0]
    if Cin % 8 or Cout % 8:
        # TODO(synk): channel counts not a multiple of 8 would need channel padding
        # to satisfy the (8, 128) block constraint.
        raise ValueError("Cin and Cout must be multiples of 8 for this kernel")

    # Column (pixel) tile: lane-dense (multiple of 128), as large as is useful.
    tn = max(128, min(tn, pl.cdiv(S, 128) * 128))
    # Keep >= 2 grid steps so both TensorCores get work on v7x.
    if batch * pl.cdiv(S, tn) < 2 and S > 128:
        tn = pl.cdiv(pl.cdiv(S, 2), 128) * 128
    n_col = pl.cdiv(S, tn)          # boundary block (if any) is masked by Pallas

    b1c = b1.reshape(Hf, 1).astype(jnp.float32)
    b2c = b2.reshape(Cout, 1).astype(jnp.float32)

    cost = pl.CostEstimate(
        flops=2 * batch * S * (Cin * Hf + Hf * Cout),
        transcendentals=0,
        bytes_accessed=(int(xf.size) * xf.dtype.itemsize
                        + int(w1.size) * w1.dtype.itemsize
                        + int(w2.size) * w2.dtype.itemsize
                        + (Hf + Cout) * 4
                        + batch * Cout * S * jnp.dtype(out_dtype).itemsize),
    )

    def build(single_buffer_weights):
        def const_spec(shape):
            idx = lambda b, j: (0, 0)
            if single_buffer_weights:
                # Weights/biases never change across the grid: one VMEM buffer is
                # enough; double-buffering them wastes VMEM at real UNet sizes.
                return pl.BlockSpec(shape, idx, pipeline_mode=pl.Buffered(1))
            return pl.BlockSpec(shape, idx)

        return pl.pallas_call(
            _mlp_kernel,
            out_shape=jax.ShapeDtypeStruct((batch * Cout, S), out_dtype),
            grid=(batch, n_col),
            in_specs=[
                pl.BlockSpec((Cin, tn), lambda b, j: (b, j)),   # x tile (channel-major)
                const_spec((Hf, Cin)),                          # W1 (VMEM-resident)
                const_spec((Hf, 1)),                            # b1 (f32)
                const_spec((Cout, Hf)),                         # W2 (VMEM-resident)
                const_spec((Cout, 1)),                          # b2 (f32)
            ],
            out_specs=pl.BlockSpec((Cout, tn), lambda b, j: (b, j)),
            compiler_params=pltpu.CompilerParams(
                dimension_semantics=("parallel", "parallel"),   # both TCs on v7x
                vmem_limit_bytes=64 * 1024 * 1024,              # above the 16/32 MiB scoped
            ),                                                  # defaults, <= v7x physical
            cost_estimate=cost,
        )

    args = (xf, w1, b1c, w2, b2c)
    try:
        return build(True)(*args)
    except Exception:
        # pl.Buffered(1) not supported by this jax/Mosaic build -> default buffering.
        return build(False)(*args)


# --------------------------------------------------------------------------- #
# Mlp.forward on NCHW input.  1x1 convs are per-pixel linears; staying
# channel-major means both NCHW<->NHWC transposes disappear (pure reshapes).
# --------------------------------------------------------------------------- #
def mlp_forward(params, x_nchw, *, tn=512):
    B, Cin, H, W = x_nchw.shape
    Hf, Cin_w = params["fc1_w"].shape
    Cout = params["fc2_w"].shape[0]
    assert Cin_w == Cin
    xf = x_nchw.reshape(B * Cin, H * W).astype(params["fc1_w"].dtype)  # reshape + bf16 cast
    yf = mlp_flat_pallas(xf, params["fc1_w"], params["fc1_b"],
                         params["fc2_w"], params["fc2_b"],
                         batch=B, out_dtype=x_nchw.dtype, tn=tn)
    return yf.reshape(B, Cout, H, W)                                   # pure reshape out


# --------------------------------------------------------------------------- #
# Deterministic parameters.  Conv2d(kernel=1) weights kept in their native
# (out_channels, in_channels) layout (so the kernel computes W @ x directly),
# stored bf16; biases stay f32.
# --------------------------------------------------------------------------- #
def init_params(key, in_features, hidden_features, out_features,
                *, param_dtype=jnp.bfloat16):
    k1, k2, k3, k4 = jax.random.split(key, 4)

    def kaiming(k, fan_in, shape):
        return jax.random.normal(k, shape, jnp.float32) * math.sqrt(2.0 / fan_in)

    return dict(
        fc1_w=kaiming(k1, in_features, (hidden_features, in_features)).astype(param_dtype),
        fc1_b=jax.random.normal(k2, (hidden_features,), jnp.float32) * 0.01,
        fc2_w=kaiming(k3, hidden_features, (out_features, hidden_features)).astype(param_dtype),
        fc2_b=jax.random.normal(k4, (out_features,), jnp.float32) * 0.01,
    )


# --------------------------------------------------------------------------- #
if __name__ == "__main__":
    key = jax.random.PRNGKey(0)
    B, Cin, H, W = 2, 64, 16, 16
    hidden, Cout = 128, 64

    kx, kp = jax.random.split(key)
    x = jax.random.normal(kx, (B, Cin, H, W), jnp.float32)
    params = init_params(kp, Cin, hidden, Cout)

    out = jax.block_until_ready(mlp_forward(params, x))
    assert out.shape == (B, Cout, H, W), out.shape
    assert bool(jnp.all(jnp.isfinite(out)))

    # Pure-JAX reference with the same bf16 inputs / f32 accumulation as the kernel.
    xr = x.reshape(B, Cin, H * W).astype(params["fc1_w"].dtype)
    h = jnp.einsum("hc,bcs->bhs", params["fc1_w"], xr,
                   preferred_element_type=jnp.float32)
    h = jnp.maximum(h + params["fc1_b"][None, :, None], 0.0).astype(params["fc2_w"].dtype)
    y = jnp.einsum("oh,bhs->bos", params["fc2_w"], h,
                   preferred_element_type=jnp.float32)
    y = y + params["fc2_b"][None, :, None]
    ref = y.reshape(B, Cout, H, W).astype(out.dtype)

    max_err = float(jnp.max(jnp.abs(out - ref)))
    assert jnp.allclose(out, ref, atol=2e-2, rtol=2e-2), max_err

    print("KERNEL_OK")
</pallas_src>

<mosaic_0001>
module attributes {stable_mosaic.version = 11 : i64} {
  func.func @_mlp_kernel(%arg0: i32, %arg1: i32, %arg2: memref<64x256xbf16, #tpu.memory_space<vmem>>, %arg3: memref<128x64xbf16, #tpu.memory_space<vmem>>, %arg4: memref<128x1xf32, #tpu.memory_space<vmem>>, %arg5: memref<64x128xbf16, #tpu.memory_space<vmem>>, %arg6: memref<64x1xf32, #tpu.memory_space<vmem>>, %arg7: memref<64x256xf32, #tpu.memory_space<vmem>>) attributes {dimension_semantics = [#tpu.dimension_semantics<parallel>, #tpu.dimension_semantics<parallel>], iteration_bounds = array<i64: 2, 1>, scalar_prefetch = 0 : i64, scratch_operands = 0 : i64, tpu.core_type = #tpu.core_type<tc>, window_params = [{transform_indices = @transform_0, window_bounds = array<i64: 64, 256>}, {pipeline_mode = #tpu.pipeline_mode<synchronous>, transform_indices = @transform_1, window_bounds = array<i64: 128, 64>}, {pipeline_mode = #tpu.pipeline_mode<synchronous>, transform_indices = @transform_2, window_bounds = array<i64: 128, 1>}, {pipeline_mode = #tpu.pipeline_mode<synchronous>, transform_indices = @transform_3, window_bounds = array<i64: 64, 128>}, {pipeline_mode = #tpu.pipeline_mode<synchronous>, transform_indices = @transform_4, window_bounds = array<i64: 64, 1>}, {transform_indices = @transform_5, window_bounds = array<i64: 64, 256>}]} {
    %c0 = arith.constant 0 : index
    %c0_0 = arith.constant 0 : index
    %0 = vector.load %arg2[%c0, %c0_0] : memref<64x256xbf16, #tpu.memory_space<vmem>>, vector<64x256xbf16>
    %c0_1 = arith.constant 0 : index
    %c0_2 = arith.constant 0 : index
    %1 = vector.load %arg3[%c0_1, %c0_2] : memref<128x64xbf16, #tpu.memory_space<vmem>>, vector<128x64xbf16>
    %cst = arith.constant dense<0.000000e+00> : vector<128x256xf32>
    %2 = tpu.matmul %1, %0, %cst {dimension_numbers = #tpu.dot_dimension_numbers<[1], [0], [0], [1], [0, 0, 1, 1], [], []>} : vector<128x64xbf16>, vector<64x256xbf16>, vector<128x256xf32> -> vector<128x256xf32>
    %c0_3 = arith.constant 0 : index
    %c0_4 = arith.constant 0 : index
    %3 = vector.load %arg4[%c0_3, %c0_4] : memref<128x1xf32, #tpu.memory_space<vmem>>, vector<128x1xf32>
    %4 = vector.broadcast %3 : vector<128x1xf32> to vector<128x256xf32>
    %5 = arith.addf %2, %4 : vector<128x256xf32>
    %cst_5 = arith.constant 0.000000e+00 : f32
    %6 = vector.broadcast %cst_5 : f32 to vector<128x256xf32>
    %7 = arith.maximumf %5, %6 : vector<128x256xf32>
    %8 = arith.truncf %7 : vector<128x256xf32> to vector<128x256xbf16>
    %c0_6 = arith.constant 0 : index
    %c0_7 = arith.constant 0 : index
    %9 = vector.load %arg5[%c0_6, %c0_7] : memref<64x128xbf16, #tpu.memory_space<vmem>>, vector<64x128xbf16>
    %cst_8 = arith.constant dense<0.000000e+00> : vector<64x256xf32>
    %10 = tpu.matmul %9, %8, %cst_8 {dimension_numbers = #tpu.dot_dimension_numbers<[1], [0], [0], [1], [0, 0, 1, 1], [], []>} : vector<64x128xbf16>, vector<128x256xbf16>, vector<64x256xf32> -> vector<64x256xf32>
    %c0_9 = arith.constant 0 : index
    %c0_10 = arith.constant 0 : index
    %11 = vector.load %arg6[%c0_9, %c0_10] : memref<64x1xf32, #tpu.memory_space<vmem>>, vector<64x1xf32>
    %12 = vector.broadcast %11 : vector<64x1xf32> to vector<64x256xf32>
    %13 = arith.addf %10, %12 : vector<64x256xf32>
    %c0_11 = arith.constant 0 : index
    %c0_12 = arith.constant 0 : index
    %14 = vector.load %arg7[%c0_11, %c0_12] : memref<64x256xf32, #tpu.memory_space<vmem>>, vector<64x256xf32>
    tpu.vector_store %arg7[%c0_11, %c0_12], %13 {strides = array<i32>} : memref<64x256xf32, #tpu.memory_space<vmem>>, vector<64x256xf32>,
    return
  }
  func.func @transform_0(%arg0: i32, %arg1: i32) -> (i32, i32) {
    %c0_i32 = arith.constant 0 : i32
    return %arg0, %arg1 : i32, i32
  }
  func.func @transform_1(%arg0: i32, %arg1: i32) -> (i32, i32) {
    %c0_i32 = arith.constant 0 : i32
    %c0_i32_0 = arith.constant 0 : i32
    %c0_i32_1 = arith.constant 0 : i32
    return %c0_i32, %c0_i32_0 : i32, i32
  }
  func.func @transform_2(%arg0: i32, %arg1: i32) -> (i32, i32) {
    %c0_i32 = arith.constant 0 : i32
    %c0_i32_0 = arith.constant 0 : i32
    %c0_i32_1 = arith.constant 0 : i32
    return %c0_i32, %c0_i32_0 : i32, i32
  }
  func.func @transform_3(%arg0: i32, %arg1: i32) -> (i32, i32) {
    %c0_i32 = arith.constant 0 : i32
    %c0_i32_0 = arith.constant 0 : i32
    %c0_i32_1 = arith.constant 0 : i32
    return %c0_i32, %c0_i32_0 : i32, i32
  }
  func.func @transform_4(%arg0: i32, %arg1: i32) -> (i32, i32) {
    %c0_i32 = arith.constant 0 : i32
    %c0_i32_0 = arith.constant 0 : i32
    %c0_i32_1 = arith.constant 0 : i32
    return %c0_i32, %c0_i32_0 : i32, i32
  }
  func.func @transform_5(%arg0: i32, %arg1: i32) -> (i32, i32) {
    %c0_i32 = arith.constant 0 : i32
    return %arg0, %arg1 : i32, i32
  }
}

module attributes {stable_mosaic.version = 11 : i64} {
  func.func @_mlp_kernel(%arg0: i32, %arg1: i32, %arg2: memref<64x256xbf16, #tpu.memory_space<vmem>>, %arg3: memref<128x64xbf16, #tpu.memory_space<vmem>>, %arg4: memref<128x1xf32, #tpu.memory_space<vmem>>, %arg5: memref<64x128xbf16, #tpu.memory_space<vmem>>, %arg6: memref<64x1xf32, #tpu.memory_space<vmem>>, %arg7: memref<64x256xf32, #tpu.memory_space<vmem>>) attributes {dimension_semantics = [#tpu.dimension_semantics<parallel>, #tpu.dimension_semantics<parallel>], iteration_bounds = array<i64: 2, 1>, scalar_prefetch = 0 : i64, scratch_operands = 0 : i64, tpu.core_type = #tpu.core_type<tc>, window_params = [{transform_indices = @transform_0, window_bounds = array<i64: 64, 256>}, {pipeline_mode = #tpu.pipeline_mode<synchronous>, transform_indices = @transform_1, window_bounds = array<i64: 128, 64>}, {pipeline_mode = #tpu.pipeline_mode<synchronous>, transform_indices = @transform_2, window_bounds = array<i64: 128, 1>}, {pipeline_mode = #tpu.pipeline_mode<synchronous>, transform_indices = @transform_3, window_bounds = array<i64: 64, 128>}, {pipeline_mode = #tpu.pipeline_mode<synchronous>, transform_indices = @transform_4, window_bounds = array<i64: 64, 1>}, {transform_indices = @transform_5, window_bounds = array<i64: 64, 256>}]} {
    %c0 = arith.constant 0 : index
    %c0_0 = arith.constant 0 : index
    %0 = vector.load %arg2[%c0, %c0_0] : memref<64x256xbf16, #tpu.memory_space<vmem>>, vector<64x256xbf16>
    %c0_1 = arith.constant 0 : index
    %c0_2 = arith.constant 0 : index
    %1 = vector.load %arg3[%c0_1, %c0_2] : memref<128x64xbf16, #tpu.memory_space<vmem>>, vector<128x64xbf16>
    %cst = arith.constant dense<0.000000e+00> : vector<128x256xf32>
    %2 = tpu.matmul %1, %0, %cst {dimension_numbers = #tpu.dot_dimension_numbers<[1], [0], [0], [1], [0, 0, 1, 1], [], []>} : vector<128x64xbf16>, vector<64x256xbf16>, vector<128x256xf32> -> vector<128x256xf32>
    %c0_3 = arith.constant 0 : index
    %c0_4 = arith.constant 0 : index
    %3 = vector.load %arg4[%c0_3, %c0_4] : memref<128x1xf32, #tpu.memory_space<vmem>>, vector<128x1xf32>
    %4 = vector.broadcast %3 : vector<128x1xf32> to vector<128x256xf32>
    %5 = arith.addf %2, %4 : vector<128x256xf32>
    %cst_5 = arith.constant 0.000000e+00 : f32
    %6 = vector.broadcast %cst_5 : f32 to vector<128x256xf32>
    %7 = arith.maximumf %5, %6 : vector<128x256xf32>
    %8 = arith.truncf %7 : vector<128x256xf32> to vector<128x256xbf16>
    %c0_6 = arith.constant 0 : index
    %c0_7 = arith.constant 0 : index
    %9 = vector.load %arg5[%c0_6, %c0_7] : memref<64x128xbf16, #tpu.memory_space<vmem>>, vector<64x128xbf16>
    %cst_8 = arith.constant dense<0.000000e+00> : vector<64x256xf32>
    %10 = tpu.matmul %9, %8, %cst_8 {dimension_numbers = #tpu.dot_dimension_numbers<[1], [0], [0], [1], [0, 0, 1, 1], [], []>} : vector<64x128xbf16>, vector<128x256xbf16>, vector<64x256xf32> -> vector<64x256xf32>
    %c0_9 = arith.constant 0 : index
    %c0_10 = arith.constant 0 : index
    %11 = vector.load %arg6[%c0_9, %c0_10] : memref<64x1xf32, #tpu.memory_space<vmem>>, vector<64x1xf32>
    %12 = vector.broadcast %11 : vector<64x1xf32> to vector<64x256xf32>
    %13 = arith.addf %10, %12 : vector<64x256xf32>
    %c0_11 = arith.constant 0 : index
    %c0_12 = arith.constant 0 : index
    %14 = vector.load %arg7[%c0_11, %c0_12] : memref<64x256xf32, #tpu.memory_space<vmem>>, vector<64x256xf32>
    tpu.vector_store %arg7[%c0_11, %c0_12], %13 {strides = array<i32>} : memref<64x256xf32, #tpu.memory_space<vmem>>, vector<64x256xf32>,
    return
  }
  func.func @transform_0(%arg0: i32, %arg1: i32) -> (i32, i32) {
    %c0_i32 = arith.constant 0 : i32
    return %arg0, %arg1 : i32, i32
  }
  func.func @transform_1(%arg0: i32, %arg1: i32) -> (i32, i32) {
    %c0_i32 = arith.constant 0 : i32
    %c0_i32_0 = arith.constant 0 : i32
    %c0_i32_1 = arith.constant 0 : i32
    return %c0_i32, %c0_i32_0 : i32, i32
  }
  func.func @transform_2(%arg0: i32, %arg1: i32) -> (i32, i32) {
    %c0_i32 = arith.constant 0 : i32
    %c0_i32_0 = arith.constant 0 : i32
    %c0_i32_1 = arith.constant 0 : i32
    return %c0_i32, %c0_i32_0 : i32, i32
  }
  func.func @transform_3(%arg0: i32, %arg1: i32) -> (i32, i32) {
    %c0_i32 = arith.constant 0 : i32
    %c0_i32_0 = arith.constant 0 : i32
    %c0_i32_1 = arith.constant 0 : i32
    return %c0_i32, %c0_i32_0 : i32, i32
  }
  func.func @transform_4(%arg0: i32, %arg1: i32) -> (i32, i32) {
    %c0_i32 = arith.constant 0 : i32
    %c0_i32_0 = arith.constant 0 : i32
    %c0_i32_1 = arith.constant 0 : i32
    return %c0_i32, %c0_i32_0 : i32, i32
  }
  func.func @transform_5(%arg0: i32, %arg1: i32) -> (i32, i32) {
    %c0_i32 = arith.constant 0 : i32
    return %arg0, %arg1 : i32, i32
  }
}

</mosaic_0001>

<bundles_post_ra>
// kernel: tpu_custom_call.1
= control target key start
LH: loop header
LB: loop body
LE: loop exit
PB: predicated region body
PF: predicated region fallthrough
CT: control target
= control target key end

     0   :  { %10 = vsyncpa [#allocation3], 0  ;;  %s1841_s0 = inlined_call_operand.hbm [shape: bf16[128,256], index: 0, kind: input, shape index: {}]   ;;  %s1842_s1 = inlined_call_operand.hbm [shape: bf16[128,64], index: 1, kind: input, shape index: {}]   ;;  %s1843_s2 = inlined_call_operand.hbm [shape: f32[128,1], index: 2, kind: input, shape index: {}]   ;;  %s1844_s3 = inlined_call_operand.hbm [shape: bf16[64,128], index: 3, kind: input, shape index: {}]   ;;  %s1845_s4 = inlined_call_operand.hbm [shape: f32[64,1], index: 4, kind: input, shape index: {}]   ;;  %s1846_s5 = inlined_call_operand.hbm [shape: f32[128,256], index: 5, kind: output, shape index: {}]  }
   0x1   :  { %12 = vsyncpa [#allocation3 + $0x1], 0 }
   0x2   :  { %13 = vsyncpa [#allocation6], 0 }
   0x3   :  { %14 = vsyncpa [#allocation9], 0 }
   0x4   :  { %15 = vsyncpa [#allocation4], 0 }
   0x5   :  { %17 = vsyncpa [#allocation4 + $0x1], 0  ;;  %s1492_s18 = smov 0   ;;  %s1494_s19 = smov 0  }
   0x6   :  { %s1496_s20 = smov 0   ;;  %s1498_s21 = smov 0  }
   0x7   :  { %s1500_s22 = smov 0   ;;  %s1502_s23 = smov 0  }
   0x8 LB: > { %1853 = sst [smem:[#allocation16_spill]] %s1427_s18  ;;  %s1022_s24 = sadd.s32 4294967295, %s1447_s23   ;;  %s1447_s23 = sphi %s1502_s23, %s23_s23   ;;  %s1443_s22 = sphi %s1500_s22, %s1876_s22   ;;  %s1439_s21 = sphi %s1498_s21, %s1875_s21   ;;  %s1435_s20 = sphi %s1496_s20, %s1874_s20   ;;  %s1431_s19 = sphi %s1494_s19, %s1873_s19   ;;  %s1427_s18 = sphi %s1492_s18, %s1872_s18  }
   0x9   : > { %s1023_s25 = sadd.s32 4294967294, %s1447_s23   ;;  %p57_p0 = scmp.ne.s32.totalorder %s1431_s19, %s1427_s18 }
   0xa   : > { %p1526_p1 = scmp.eq.s32.totalorder %s1022_s24, 0  ;;  %p1530_p2 = scmp.eq.s32.totalorder %s1022_s24, 1 }
   0xb   : > { %p173_p3 = scmp.eq.s32.totalorder %s1023_s25, 1  ;;  %p1024_p5 = scmp.ge.s32.totalorder %s1447_s23, 1 }
   0xc   : > { %s1854_s26 = scalar_select %p1526_p1, 1, 0 }
   0xd   : > { %s1855_s27 = scalar_select %p1530_p2, 1, 0 }
   0xe   : > { %p1536_p4 = por %p1526_p1, %p57_p0  ;;  %p1541_p6 = por %p173_p3, %p57_p0 }
   0xf   : > { %p180_p7 = scmp.lt.s32.totalorder %s1447_s23, 3  ;;  %s1449_s6 = smov [#allocation5]  }
  0x10   : > { %s1856_s28 = scalar_select %p1536_p4, 1, 0 }
  0x11   : > { %s1857_s29 = scalar_select %p1541_p6, 1, 0 }
  0x12   : > { %p1546_p8 = pnand %p1024_p5, %p180_p7  ;;  %s192_s7 = sshll.u32 %s1449_s6, 4  ;;  %s1550_s7 = int_to_ptr.vmem [resolvable:$true] %s192_s7 }
  0x13   : > { %1858 = sst [smem:[#allocation17_spill]] %s1857_s29  ;;  %s1450_s9 = smov [#allocation8]  }
  0x14   : > { %s1859_s30 = scalar_select %p1546_p8, 1, 0 }
  0x15   : > { %p1099_p9 = pneg %p1546_p8  ;;  %s218_s10 = sshll.u32 %s1450_s9, 4  ;;  %s1561_s10 = int_to_ptr.vmem [resolvable:$true] %s218_s10 }
  0x16   : > { %s1451_s11 = smov [#allocation7]   ;;  %s1215_s15 = scalar_lea.hbm %s1842_s1, 1024 }
  0x17   : > { %p1557_p11 = pnand %p1099_p9, %p1526_p1  ;;  %s1563_s12 = sshll.u32 %s1451_s11, 4  ;;  %s206_s12 = int_to_ptr.vmem [resolvable:$true] %s1563_s12 }
  0x18   : > { %p1216_p12 = scmp.ne.s32.totalorder %s1842_s1, %s1215_s15  ;;  %p1222_p5 = scmp.lt.u32.totalorder %s1215_s15, %s1842_s1 }
  0x19   : > { %p1573_p13 = pneg %p1557_p11 }
  0x1b   : > { %p1218_p0 = pnand %p1573_p13, %p1216_p12 }
  0x1d   : > { %p1219_p3 = pneg %p1218_p0 }
  0x1f   : > { %p1224_p7 = pnand %p1222_p5, %p1219_p3 }
  0x21   : > { %1227 = shalt.err (!%p1224_p7)
}
  0x22   : > { %s1228_s9 = scalar_lea.vmem %s1550_s7, 1024  ;;  %p1236_p1 = scmp.lt.s32.totalorder %s1550_s7, %s1550_s7 }
  0x23   : > { %p1229_p9 = scmp.ne.s32.totalorder %s1550_s7, %s1228_s9  ;;  %p1237_p4 = scmp.lt.s32.totalorder %s1228_s9, %s1228_s9 }
  0x25   : > { %p1231_p10 = pnand %p1229_p9, %p1573_p13  ;;  %p1238_p12 = por %p1237_p4, %p1236_p1 }
  0x27   : > { %p1232_p6 = pneg %p1231_p10 }
  0x29   : > { %p1239_p0 = pnand %p1238_p12, %p1232_p6 }
  0x2b   : > { %1242 = shalt.err (!%p1239_p0)
}
  0x2c   : > { %s1452_s11 = smov 64   ;;  %s1453_s13 = smov 4  }
  0x2d   : > { %1102 = dma.hbm_to_vmem [thread:$0]  (!%p1557_p11), %s1842_s1, 1024, %s1550_s7, [#allocation6], %s1452_s11, %s1452_s11, %s1453_s13  }
  0x2e   : > { %s1243_s25 = scalar_lea.hbm %s1844_s3, 512 }
  0x2f   : > { %p1244_p1 = scmp.ne.s32.totalorder %s1844_s3, %s1243_s25  ;;  %p1250_p10 = scmp.lt.u32.totalorder %s1243_s25, %s1844_s3 }
  0x31   : > { %p1246_p4 = pnand %p1244_p1, %p1573_p13 }
  0x33   : > { %p1247_p6 = pneg %p1246_p4 }
  0x35   : > { %p1252_p3 = pnand %p1250_p10, %p1247_p6 }
  0x37   : > { %1255 = shalt.err (!%p1252_p3)
}
  0x38   : > { %s1256_s7 = scalar_lea.vmem %s1561_s10, 512  ;;  %p1264_p12 = scmp.lt.s32.totalorder %s1561_s10, %s1561_s10 }
  0x39   : > { %p1257_p5 = scmp.ne.s32.totalorder %s1561_s10, %s1256_s7  ;;  %p1265_p0 = scmp.lt.s32.totalorder %s1256_s7, %s1256_s7 }
  0x3b   : > { %p1259_p7 = pnand %p1257_p5, %p1573_p13  ;;  %p1266_p1 = por %p1265_p0, %p1264_p12 }
  0x3d   : > { %p1260_p9 = pneg %p1259_p7 }
  0x3f   : > { %p1267_p4 = pnand %p1266_p1, %p1260_p9 }
  0x41   : > { %1270 = shalt.err (!%p1267_p4)
}
  0x42   : > { %1108 = dma.hbm_to_vmem [thread:$0]  (!%p1557_p11), %s1844_s3, 512, %s1561_s10, [#allocation9], %s1452_s11, %s1452_s11, %s1453_s13  }
  0x43   : > { %s1271_s16 = scalar_lea.hbm %s1843_s2, 2048 }
  0x44   : > { %p1272_p6 = scmp.ne.s32.totalorder %s1843_s2, %s1271_s16  ;;  %p1278_p5 = scmp.lt.u32.totalorder %s1271_s16, %s1843_s2 }
  0x46   : > { %p1274_p10 = pnand %p1272_p6, %p1573_p13 }
  0x48   : > { %p1275_p3 = pneg %p1274_p10 }
  0x4a   : > { %p1280_p7 = pnand %p1278_p5, %p1275_p3 }
  0x4c   : > { %1283 = shalt.err (!%p1280_p7)
}
  0x4d   : > { %s1284_s7 = scalar_lea.vmem %s206_s12, 2048  ;;  %p1292_p1 = scmp.lt.s32.totalorder %s206_s12, %s206_s12 }
  0x4e   : > { %p1285_p9 = scmp.ne.s32.totalorder %s206_s12, %s1284_s7  ;;  %p1293_p4 = scmp.lt.s32.totalorder %s1284_s7, %s1284_s7 }
  0x50   : > { %p1287_p12 = pnand %p1285_p9, %p1573_p13  ;;  %p1294_p8 = por %p1293_p4, %p1292_p1 }
  0x52   : > { %p1288_p0 = pneg %p1287_p12 }
  0x54   : > { %p1295_p2 = pnand %p1294_p8, %p1288_p0 }
  0x56   : > { %1298 = shalt.err (!%p1295_p2)
}
  0x57   : > { %s1454_s10 = smov 128   ;;  %s1455_s11 = smov 8  }
  0x58   : > { %1105 = dma.hbm_to_vmem [thread:$0]  (!%p1557_p11), %s1843_s2, 2048, %s206_s12, [#allocation6], %s1454_s10, %s1454_s10, %s1455_s11  }
  0x59   : > { %s1456_s29 = smov [#allocation10]   ;;  %s1299_s17 = scalar_lea.hbm %s1845_s4, 1024 }
  0x5a   : > { %s231_s14 = sshll.u32 %s1456_s29, 4  ;;  %p1300_p2 = scmp.ne.s32.totalorder %s1845_s4, %s1299_s17  ;;  %s232_s14 = int_to_ptr.vmem [resolvable:$true] %s231_s14 }
  0x5b   : > { %p1306_p10 = scmp.lt.u32.totalorder %s1299_s17, %s1845_s4 }
  0x5c   : > { %p1302_p8 = pnand %p1300_p2, %p1573_p13 }
  0x5e   : > { %p1303_p6 = pneg %p1302_p8 }
  0x60   : > { %p1308_p3 = pnand %p1306_p10, %p1303_p6 }
  0x62   : > { %1311 = shalt.err (!%p1308_p3)
}
  0x63   : > { %s1312_s12 = scalar_lea.vmem %s232_s14, 1024  ;;  %p1320_p12 = scmp.lt.s32.totalorder %s232_s14, %s232_s14 }
  0x64   : > { %p1313_p5 = scmp.ne.s32.totalorder %s232_s14, %s1312_s12  ;;  %p1321_p0 = scmp.lt.s32.totalorder %s1312_s12, %s1312_s12 }
  0x66   : > { %p1315_p7 = pnand %p1313_p5, %p1573_p13  ;;  %p1322_p1 = por %p1321_p0, %p1320_p12 }
  0x68   : > { %p1316_p9 = pneg %p1315_p7 }
  0x6a   : > { %p1323_p4 = pnand %p1322_p1, %p1316_p9 }
  0x6c   : > { %1326 = shalt.err (!%p1323_p4)
}
  0x6d   : > { %1111 = dma.hbm_to_vmem [thread:$0]  (!%p1557_p11), %s1845_s4, 1024, %s232_s14, [#allocation9], %s1454_s10, %s1454_s10, %s1455_s11  }
  0x6e   : > { %s35_s24 = sadd.s32 1, %s1443_s22  ;;  %s44_s8 = sadd.s32 1, %s1435_s20 }
  0x6f   : > { %p37_p13 = scmp.ge.s32.totalorder %s35_s24, 2  ;;  %p51_p2 = scmp.ne.s32.totalorder %s1435_s20, %s1431_s19 }
  0x70   : > { %p52_p8 = scmp.eq.s32.totalorder %s1447_s23, 0  ;;  %p1124_p6 = scmp.lt.s32.totalorder %s1447_s23, 2 }
  0x71   : > { %s1878_s24 = smov (%p37_p13, %s35_s24), 0  ;;  %p1862_p3 = scmp.ne.s32.totalorder %s1855_s27, 0 }
  0x72   : > { %p53_p10 = por %p52_p8, %p51_p2  ;;  %s39_s15 = ssub.s32 %s1443_s22, %s1878_s24 }
  0x73   : > { %p1670_p5 = por %p1862_p3, %p51_p2  ;;  %s245_s16 = sand.u32 1, %s1435_s20  }
  0x74   : > { %p42_p7 = scmp.eq.s32.totalorder %s39_s15, 0  ;;  %s1030_s14 = sshll.u32 %s245_s16, 6 }
  0x75   : > { %s1076_s17 = sshll.u32 %s1443_s22, 10  ;;  %s249_s27 = scalar_lea.vmem [#allocation2], %s1030_s14 }
  0x76   : > { %s1679_s25 = scalar_select %p42_p7, %s1435_s20, %s44_s8  }
  0x77   : > { %s1684_s7 = scalar_lea.hbm %s1841_s0, %s1076_s17  ;;  %s259_s12 = sshll.u32 %s249_s27, 4  ;;  %s1692_s12 = int_to_ptr.vmem [resolvable:$true] %s259_s12 }
  0x78   : > { %p1688_p11 = pnand %p1124_p6, %p53_p10  ;;  %s1694_s18 = scalar_lea.sflag [#allocation3], %s245_s16 }
  0x79   : > { %s1327_s8 = scalar_lea.hbm %s1684_s7, 1024  ;;  %s1332_s17 = scalar_lea.hbm %s1841_s0, 2048 }
  0x7a   : > { %p1328_p9 = scmp.ne.s32.totalorder %s1684_s7, %s1327_s8  ;;  %p1329_p12 = pneg %p1688_p11 }
  0x7b   : > { %p1333_p4 = scmp.lt.u32.totalorder %s1684_s7, %s1841_s0  ;;  %p1334_p13 = scmp.lt.u32.totalorder %s1332_s17, %s1327_s8 }
  0x7c   : > { %p1330_p0 = pnand %p1329_p12, %p1328_p9  ;;  %p1336_p8 = scmp.lt.u32.totalorder %s1327_s8, %s1684_s7 }
  0x7d   : > { %p1335_p2 = por %p1334_p13, %p1333_p4 }
  0x7e   : > { %p1331_p1 = pneg %p1330_p0 }
  0x7f   : > { %p1337_p6 = por %p1336_p8, %p1335_p2 }
  0x81   : > { %p1338_p10 = pnand %p1337_p6, %p1331_p1 }
  0x83   : > { %1341 = shalt.err (!%p1338_p10)
}
  0x84   : > { %s1342_s16 = scalar_lea.vmem %s1692_s12, 1024  ;;  %s1457_s27 = smov [#allocation2]  }
  0x85   : > { %p1343_p3 = scmp.ne.s32.totalorder %s1692_s12, %s1342_s16  ;;  %s1347_s15 = sshll.u32 %s1457_s27, 4  ;;  %s1348_s15 = int_to_ptr.vmem [resolvable:$false] %s1347_s15 }
  0x86   : > { %s1349_s14 = scalar_lea.vmem %s1348_s15, 2048  ;;  %p1350_p0 = scmp.lt.s32.totalorder %s1692_s12, %s1348_s15 }
  0x87   : > { %p1345_p7 = pnand %p1343_p3, %p1329_p12  ;;  %p1351_p4 = scmp.lt.s32.totalorder %s1349_s14, %s1342_s16 }
  0x89   : > { %p1346_p9 = pneg %p1345_p7  ;;  %p1352_p13 = por %p1351_p4, %p1350_p0 }
  0x8b   : > { %p1353_p2 = pnand %p1352_p13, %p1346_p9 }
  0x8d   : > { %1356 = shalt.err (!%p1353_p2)
}
  0x8e   : > { %1115 = dma.hbm_to_vmem [thread:$0]  (!%p1688_p11), %s1684_s7, 1024, %s1692_s12, %s1694_s18, %s1454_s10, %s1454_s10, %s1455_s11  }
  0x8f   : > { %p1865_p12 = scmp.ne.s32.totalorder %s1859_s30, 0 }
  0x90   : > { %s1728_s8 = sand.u32 (!%p1865_p12), 1, %s1431_s19   ;;  %p1866_p1 = scmp.ne.s32.totalorder (!%p1865_p12), %s1856_s28, 0 }
  0x91   : > { %271 = sbr.rel (%p1865_p12) target bundleno = 714 (0x2ca), region = 40  ;;  %s1035_s17 = sshll.u32 (!%p1865_p12), %s1728_s8, 6 }
  0x92   : > { %s274_s6 = scalar_lea.sflag (!%p1865_p12), [#allocation3], %s1728_s8  ;;  %s277_s9 = scalar_lea.vmem (!%p1865_p12), [#allocation2], %s1035_s17 }
  0x98   : > { %1410 = dma.done.wait (%p1866_p1), %s274_s6, 1024  }
  0x99   : > { %1412 = vsyncadd (%p1866_p1), %s274_s6, 4294966272  ;;  %p1867_p8 = scmp.ne.s32.totalorder %s1854_s26, 0 }
  0x9b   : > { %1414 = dma.done.wait (%p1867_p8), [#allocation6], 3072  }
  0x9c   : > { %1416 = vsyncadd (%p1867_p8), [#allocation6], 4294964224 }
  0x9d   : > { %1418 = dma.done.wait (%p1867_p8), [#allocation9], 1536  }
  0x9e   : > { %1420 = vsyncadd (%p1867_p8), [#allocation9], 4294965760  ;;  %v1458_v0 = vmov 0   ;;  %v1191_v1 = vld [vmem:[%s277_s9 + $0x4] ss:$8 sps:$4 sm:$0xff]   ;;  %v351_v10 = vld [vmem:[#allocation7 + $0x10] sm:$0xff] }
  0x9f   : > { %582 = vmatprep.mubr.bf16.mxu0 %v1458_v0  ;;  %1189 = vset.pattern.permute.xlu0 %v1458_v0  ;;  %v1193_v2 = vld [vmem:[%s277_s9] ss:$8 sps:$4 sm:$0xff]   ;;  %v1194_v3 = vld [vmem:[%s277_s9 + $0x14] ss:$8 sps:$4 sm:$0xff]   ;;  %v1196_v4 = vld [vmem:[%s277_s9 + $0x10] ss:$8 sps:$4 sm:$0xff]  }
  0xa0   : > { %1190 = vset.pattern.permute.xlu1 %v1458_v0  ;;  %823 = vmatprep.mubr.bf16.mxu1 %v1458_v0  ;;  %v1197_v5 = vld [vmem:[%s277_s9 + $0x24] ss:$8 sps:$4 sm:$0xff]   ;;  %v1199_v6 = vld [vmem:[%s277_s9 + $0x20] ss:$8 sps:$4 sm:$0xff]   ;;  %v1200_v7 = vld [vmem:[%s277_s9 + $0x34] ss:$8 sps:$4 sm:$0xff]  }
  0xa1   : > { %550 = vmatprep.subr.bf16.mxu0 %v1191_v1  ;;  %v1202_v8 = vld [vmem:[%s277_s9 + $0x30] ss:$8 sps:$4 sm:$0xff]   ;;  %v349_v9 = vld [vmem:[#allocation7] sm:$0xff]  ;;  %377 = vperm.xlu1 %1190, %v351_v10   ;;  %vm525_vm0 = vcmask 523264   ;;  %v350_v12 = vld [vmem:[#allocation7 + $0x8] sm:$0xff]  ;;  %s1040_s26 = sshll.u32 %s1728_s8, 7 }
  0xa2   : > { %551 = vmatpush1.bf16.msra.mxu0 %v1193_v2  ;;  %v1203_v11 = vld [vmem:[#allocation5] sm:$0xff]   ;;  %367 = vperm.xlu0 %1189, %v349_v9   ;;  %v352_v13 = vld [vmem:[#allocation7 + $0x18] sm:$0xff]  ;;  %v1204_v15 = vld [vmem:[#allocation5 + $0x8] sm:$0xff]   ;;  %s1767_s28 = scalar_lea.vmem [#allocation11], %s1040_s26  ;;  %s1078_s30 = sshll.u32 %s1439_s21, 11 }
  0xa3   : > { %552 = vmatprep.subr.bf16.mxu0 %v1194_v3  ;;  %v353_v14 = vld [vmem:[#allocation7 + $0x20] sm:$0xff]  ;;  %v354_v16 = vld [vmem:[#allocation7 + $0x28] sm:$0xff]  ;;  %v355_v17 = vld [vmem:[#allocation7 + $0x30] sm:$0xff]  ;;  %s897_s10 = sshll.u32 %s1767_s28, 4  ;;  %s1787_s12 = scalar_lea.hbm %s1846_s5, %s1078_s30  ;;  %s1789_s10 = int_to_ptr.vmem [resolvable:$true] %s897_s10 }
  0xa4   : > { %v356_v18 = vld [vmem:[#allocation7 + $0x38] sm:$0xff]  ;;  %v357_v19 = vld [vmem:[#allocation7 + $0x40] sm:$0xff]  ;;  %v358_v20 = vld [vmem:[#allocation7 + $0x48] sm:$0xff]  ;;  %s881_s21 = scalar_lea.sflag [#allocation4], %s1728_s8  ;;  %s1357_s13 = scalar_lea.vmem %s1789_s10, 2048 }
  0xa5   : > { %382 = vperm.xlu1 %1190, %v352_v13   ;;  %v1205_v21 = vld [vmem:[#allocation5 + $0x10] sm:$0xff]   ;;  %v360_v23 = vld [vmem:[#allocation7 + $0x58] sm:$0xff]  ;;  %v361_v24 = vld [vmem:[#allocation7 + $0x60] sm:$0xff]  ;;  %p1358_p11 = scmp.ne.s32.totalorder %s1789_s10, %s1357_s13  ;;  %s1459_s18 = smov [#allocation11]  }
  0xa6   : > { %553 = vmatpush1.bf16.msra.mxu0 %v1196_v4  ;;  %372 = vperm.xlu0 %1189, %v350_v12   ;;  %v359_v22 = vld [vmem:[#allocation7 + $0x50] sm:$0xff]  ;;  %v362_v25 = vld [vmem:[#allocation7 + $0x68] sm:$0xff]  ;;  %v1206_v26 = vld [vmem:[#allocation5 + $0x18] sm:$0xff]   ;;  %s1361_s16 = sshll.u32 %s1459_s18, 4  ;;  %s1362_s16 = int_to_ptr.vmem [resolvable:$false] %s1361_s16 }
  0xa7   : > { %554 = vmatprep.subr.bf16.mxu0 %v1197_v5  ;;  %v363_v27 = vld [vmem:[#allocation7 + $0x70] sm:$0xff]  ;;  %v364_v28 = vld [vmem:[#allocation7 + $0x78] sm:$0xff]  ;;  %v719_v29 = vld [vmem:[#allocation10] sm:$0xff]  ;;  %p1359_p6 = pnand %p1358_p11, %p1670_p5  ;;  %s1363_s27 = scalar_lea.vmem %s1362_s16, 4096 }
  0xa8   : > { %v720_v30 = vld [vmem:[#allocation10 + $0x8] sm:$0xff]  ;;  %v1207_v31 = vld [vmem:[#allocation5 + $0x20] sm:$0xff]   ;;  %v721_v32 = vld [vmem:[#allocation10 + $0x10] sm:$0xff]  ;;  %p1364_p3 = scmp.lt.s32.totalorder %s1789_s10, %s1362_s16  ;;  %p1365_p7 = scmp.lt.s32.totalorder %s1363_s27, %s1357_s13 }
  0xa9   : > { %392 = vperm.xlu1 %1190, %v354_v16   ;;  %v722_v33 = vld [vmem:[#allocation10 + $0x18] sm:$0xff]  ;;  %v723_v34 = vld [vmem:[#allocation10 + $0x20] sm:$0xff]  ;;  %v724_v35 = vld [vmem:[#allocation10 + $0x28] sm:$0xff]  ;;  %p1360_p10 = pneg %p1359_p6 }
  0xaa   : > { %555 = vmatpush1.bf16.msra.mxu0 %v1199_v6  ;;  %387 = vperm.xlu0 %1189, %v353_v14   ;;  %v1208_v36 = vld [vmem:[#allocation5 + $0x28] sm:$0xff]   ;;  %v725_v37 = vld [vmem:[#allocation10 + $0x30] sm:$0xff]  ;;  %v726_v38 = vld [vmem:[#allocation10 + $0x38] sm:$0xff]  ;;  %p1366_p9 = por %p1365_p7, %p1364_p3 }
  0xab   : > { %556 = vmatprep.subr.bf16.mxu0 %v1200_v7  ;;  %v1209_v39 = vld [vmem:[#allocation5 + $0x30] sm:$0xff]   ;;  %v1210_v40 = vld [vmem:[#allocation5 + $0x38] sm:$0xff]  }
  0xac   : > { %p1367_p0 = pnand %p1366_p9, %p1360_p10 }
  0xad   : > { %402 = vperm.xlu1 %1190, %v356_v18  }
  0xae   : > { %557 = vmatpush1.bf16.msra.mxu0 %v1202_v8  ;;  %397 = vperm.xlu0 %1189, %v355_v17  }
  0xb1   : > { %1057 = vmatmul.mubr.msk.bf16.vlgmr.msra.gmra.mrb[0].mxu0 %vm525_vm0, %v1203_v11  ;;  %412 = vperm.xlu1 %1190, %v358_v20  }
  0xb2   : > { %592 = vmatprep.mubr.bf16.mxu0 %v1458_v0  ;;  %407 = vperm.xlu0 %1189, %v357_v19  }
  0xb5   : > { %422 = vperm.xlu1 %1190, %v360_v23  }
  0xb6   : > { %417 = vperm.xlu0 %1189, %v359_v22  }
  0xb9   : > { %1058 = vmatmul.mubr.msk.bf16.gmra.mrb[4].mxu0 %vm525_vm0, %v1204_v15  ;;  %432 = vperm.xlu1 %1190, %v362_v25  }
  0xba   : > { %602 = vmatprep.mubr.bf16.mxu0 %v1458_v0  ;;  %427 = vperm.xlu0 %1189, %v361_v24  }
  0xbd   : > { %442 = vperm.xlu1 %1190, %v364_v28  }
  0xbe   : > { %437 = vperm.xlu0 %1189, %v363_v27  }
  0xc1   : > { %1059 = vmatmul.mubr.msk.bf16.gmra.mrb[8].mxu0 %vm525_vm0, %v1205_v21  ;;  %734 = vperm.xlu1 %1190, %v720_v30  }
  0xc2   : > { %612 = vmatprep.mubr.bf16.mxu0 %v1458_v0  ;;  %729 = vperm.xlu0 %1189, %v719_v29  }
  0xc5   : > { %744 = vperm.xlu1 %1190, %v722_v33  }
  0xc6   : > { %739 = vperm.xlu0 %1189, %v721_v32  }
  0xc9   : > { %1060 = vmatmul.mubr.msk.bf16.gmra.mrb[12].mxu0 %vm525_vm0, %v1206_v26  ;;  %754 = vperm.xlu1 %1190, %v724_v35  }
  0xca   : > { %622 = vmatprep.mubr.bf16.mxu0 %v1458_v0  ;;  %749 = vperm.xlu0 %1189, %v723_v34  }
  0xcd   : > { %764 = vperm.xlu1 %1190, %v726_v38  }
  0xce   : > { %759 = vperm.xlu0 %1189, %v725_v37  }
  0xd1   : > { %1061 = vmatmul.mubr.msk.bf16.gmra.mrb[16].mxu0 %vm525_vm0, %v1207_v31 }
  0xd2   : > { %632 = vmatprep.mubr.bf16.mxu0 %v1458_v0 }
  0xd9   : > { %1062 = vmatmul.mubr.msk.bf16.gmra.mrb[20].mxu0 %vm525_vm0, %v1208_v36 }
  0xda   : > { %642 = vmatprep.mubr.bf16.mxu0 %v1458_v0 }
  0xe1   : > { %1063 = vmatmul.mubr.msk.bf16.gmra.mrb[24].mxu0 %vm525_vm0, %v1209_v39 }
  0xe2   : > { %652 = vmatprep.mubr.bf16.mxu0 %v1458_v0 }
  0xe9   : > { %1064 = vmatmul.mubr.msk.bf16.gmra.mrb[28].mxu0 %vm525_vm0, %v1210_v40 }
 0x120   : > { %v378_v50 = vpop.permute.xlu1 %377 }
 0x121   : > { %v368_v41 = vpop.permute.xlu0 %367 }
 0x124   : > { %v383_v61 = vpop.permute.xlu1 %382 }
 0x125   : > { %v373_v45 = vpop.permute.xlu0 %372 }
 0x128   : > { %v393_v14 = vpop.permute.xlu1 %392 }
 0x129   : > { %v388_v9 = vpop.permute.xlu0 %387 }
 0x12c   : > { %v403_v30 = vpop.permute.xlu1 %402 }
 0x12d   : > { %v398_v25 = vpop.permute.xlu0 %397 }
 0x184   : > { %v584_v42 = vpop.f32.mrb[0].mxu0 }
 0x185   : > { %v585_v43 = vadd.f32 %v584_v42, %v368_v41  ;;  %v586_v44 = vpop.f32.mrb[1].mxu0 }
 0x186   : > { %v587_v46 = vadd.f32 %v586_v44, %v368_v41  ;;  %v588_v47 = vpop.f32.mrb[2].mxu0  ;;  %v408_v41 = vpop.permute.xlu0 %407 }
 0x187   : > { %v589_v48 = vadd.f32 %v588_v47, %v373_v45  ;;  %v590_v49 = vpop.f32.mrb[3].mxu0  ;;  %v663_v52 = vmax.f32 %v585_v43, 0.0 }
 0x188   : > { %v591_v51 = vadd.f32 %v590_v49, %v373_v45  ;;  %v664_v54 = vmax.f32 %v587_v46, 0.0  ;;  %v413_v46 = vpop.permute.xlu1 %412 }
 0x189   : > { %v665_v53 = vmax.f32 %v589_v48, 0.0 }
 0x18a   : > { %v666_v55 = vmax.f32 %v591_v51, 0.0 }
 0x18b   : > { %v695_v56 = vpack.c.bf16 %v665_v53, %v663_v52 }
 0x18c   : > { %v594_v57 = vpop.f32.mrb[4].mxu0  ;;  %v696_v58 = vpack.c.bf16 %v666_v55, %v664_v54 }
 0x18d   : > { %v595_v59 = vadd.f32 %v594_v57, %v378_v50  ;;  %v596_v60 = vpop.f32.mrb[5].mxu0  ;;  %v418_v57 = vpop.permute.xlu0 %417 }
 0x18e   : > { %v597_v62 = vadd.f32 %v596_v60, %v378_v50  ;;  %v598_v63 = vpop.f32.mrb[6].mxu0  ;;  %791 = vmatprep.subr.bf16.mxu1 %v696_v58 }
 0x18f   : > { %v599_v1 = vadd.f32 %v598_v63, %v383_v61  ;;  %v600_v2 = vpop.f32.mrb[7].mxu0  ;;  %792 = vmatpush1.bf16.msra.mxu1 %v695_v56  ;;  %v667_v4 = vmax.f32 %v595_v59, 0.0 }
 0x190   : > { %v601_v3 = vadd.f32 %v600_v2, %v383_v61  ;;  %v668_v6 = vmax.f32 %v597_v62, 0.0  ;;  %v423_v62 = vpop.permute.xlu1 %422 }
 0x191   : > { %v669_v5 = vmax.f32 %v599_v1, 0.0 }
 0x192   : > { %v670_v7 = vmax.f32 %v601_v3, 0.0 }
 0x193   : > { %v697_v8 = vpack.c.bf16 %v669_v5, %v667_v4 }
 0x194   : > { %v698_v10 = vpack.c.bf16 %v670_v7, %v668_v6  ;;  %v604_v11 = vpop.f32.mrb[8].mxu0 }
 0x195   : > { %v605_v12 = vadd.f32 %v604_v11, %v388_v9  ;;  %v606_v13 = vpop.f32.mrb[9].mxu0 }
 0x196   : > { %v607_v15 = vadd.f32 %v606_v13, %v388_v9  ;;  %v608_v16 = vpop.f32.mrb[10].mxu0  ;;  %793 = vmatprep.subr.bf16.mxu1 %v698_v10  ;;  %v428_v10 = vpop.permute.xlu0 %427 }
 0x197   : > { %v609_v17 = vadd.f32 %v608_v16, %v393_v14  ;;  %v610_v18 = vpop.f32.mrb[11].mxu0  ;;  %794 = vmatpush1.bf16.msra.mxu1 %v697_v8  ;;  %v671_v20 = vmax.f32 %v605_v12, 0.0 }
 0x198   : > { %v611_v19 = vadd.f32 %v610_v18, %v393_v14  ;;  %v672_v22 = vmax.f32 %v607_v15, 0.0  ;;  %v433_v15 = vpop.permute.xlu1 %432 }
 0x199   : > { %v673_v21 = vmax.f32 %v609_v17, 0.0 }
 0x19a   : > { %v674_v23 = vmax.f32 %v611_v19, 0.0 }
 0x19b   : > { %v699_v24 = vpack.c.bf16 %v673_v21, %v671_v20 }
 0x19c   : > { %v700_v26 = vpack.c.bf16 %v674_v23, %v672_v22  ;;  %v614_v27 = vpop.f32.mrb[12].mxu0 }
 0x19d   : > { %v615_v28 = vadd.f32 %v614_v27, %v398_v25  ;;  %v616_v29 = vpop.f32.mrb[13].mxu0 }
 0x19e   : > { %v617_v31 = vadd.f32 %v616_v29, %v398_v25  ;;  %v618_v32 = vpop.f32.mrb[14].mxu0  ;;  %795 = vmatprep.subr.bf16.mxu1 %v700_v26  ;;  %v438_v26 = vpop.permute.xlu0 %437 }
 0x19f   : > { %v619_v33 = vadd.f32 %v618_v32, %v403_v30  ;;  %v620_v34 = vpop.f32.mrb[15].mxu0  ;;  %796 = vmatpush1.bf16.msra.mxu1 %v699_v24  ;;  %v675_v36 = vmax.f32 %v615_v28, 0.0 }
 0x1a0   : > { %v621_v35 = vadd.f32 %v620_v34, %v403_v30  ;;  %v676_v38 = vmax.f32 %v617_v31, 0.0  ;;  %v443_v31 = vpop.permute.xlu1 %442 }
 0x1a1   : > { %v677_v37 = vmax.f32 %v619_v33, 0.0 }
 0x1a2   : > { %v678_v39 = vmax.f32 %v621_v35, 0.0 }
 0x1a3   : > { %v701_v40 = vpack.c.bf16 %v677_v37, %v675_v36 }
 0x1a4   : > { %v702_v42 = vpack.c.bf16 %v678_v39, %v676_v38  ;;  %v624_v43 = vpop.f32.mrb[16].mxu0 }
 0x1a5   : > { %v625_v44 = vadd.f32 %v624_v43, %v408_v41  ;;  %v626_v45 = vpop.f32.mrb[17].mxu0  ;;  %v1211_v43 = vld [vmem:[#allocation8] sm:$0xff]  }
 0x1a6   : > { %v627_v47 = vadd.f32 %v626_v45, %v408_v41  ;;  %v628_v48 = vpop.f32.mrb[18].mxu0  ;;  %797 = vmatprep.subr.bf16.mxu1 %v702_v42  ;;  %v1213_v45 = vld [vmem:[#allocation8 + $0x10] sm:$0xff]  }
 0x1a7   : > { %v629_v49 = vadd.f32 %v628_v48, %v413_v46  ;;  %v630_v50 = vpop.f32.mrb[19].mxu0  ;;  %798 = vmatpush1.bf16.msra.mxu1 %v701_v40  ;;  %v679_v52 = vmax.f32 %v625_v44, 0.0  ;;  %v1212_v44 = vld [vmem:[#allocation8 + $0x8] sm:$0xff]  }
 0x1a8   : > { %v631_v51 = vadd.f32 %v630_v50, %v413_v46  ;;  %v680_v54 = vmax.f32 %v627_v47, 0.0  ;;  %v1214_v46 = vld [vmem:[#allocation8 + $0x18] sm:$0xff]   ;;  %v730_v47 = vpop.permute.xlu0 %729 }
 0x1a9   : > { %v681_v53 = vmax.f32 %v629_v49, 0.0 }
 0x1aa   : > { %v682_v55 = vmax.f32 %v631_v51, 0.0  ;;  %v735_v51 = vpop.permute.xlu1 %734 }
 0x1ab   : > { %v703_v56 = vpack.c.bf16 %v681_v53, %v679_v52 }
 0x1ac   : > { %v704_v58 = vpack.c.bf16 %v682_v55, %v680_v54  ;;  %v634_v59 = vpop.f32.mrb[20].mxu0 }
 0x1ad   : > { %v635_v60 = vadd.f32 %v634_v59, %v418_v57  ;;  %v636_v61 = vpop.f32.mrb[21].mxu0 }
 0x1ae   : > { %v637_v63 = vadd.f32 %v636_v61, %v418_v57  ;;  %v638_v1 = vpop.f32.mrb[22].mxu0  ;;  %799 = vmatprep.subr.bf16.mxu1 %v704_v58 }
 0x1af   : > { %v639_v2 = vadd.f32 %v638_v1, %v423_v62  ;;  %v640_v3 = vpop.f32.mrb[23].mxu0  ;;  %800 = vmatpush1.bf16.msra.mxu1 %v703_v56  ;;  %v683_v5 = vmax.f32 %v635_v60, 0.0  ;;  %v740_v56 = vpop.permute.xlu0 %739 }
 0x1b0   : > { %v641_v4 = vadd.f32 %v640_v3, %v423_v62  ;;  %v684_v7 = vmax.f32 %v637_v63, 0.0  ;;  %v745_v60 = vpop.permute.xlu1 %744 }
 0x1b1   : > { %v685_v6 = vmax.f32 %v639_v2, 0.0 }
 0x1b2   : > { %v686_v8 = vmax.f32 %v641_v4, 0.0 }
 0x1b3   : > { %v705_v9 = vpack.c.bf16 %v685_v6, %v683_v5  ;;  %v750_v3 = vpop.permute.xlu0 %749 }
 0x1b4   : > { %v706_v11 = vpack.c.bf16 %v686_v8, %v684_v7  ;;  %v644_v12 = vpop.f32.mrb[24].mxu0  ;;  %v755_v7 = vpop.permute.xlu1 %754 }
 0x1b5   : > { %v645_v13 = vadd.f32 %v644_v12, %v428_v10  ;;  %v646_v14 = vpop.f32.mrb[25].mxu0 }
 0x1b6   : > { %v647_v16 = vadd.f32 %v646_v14, %v428_v10  ;;  %v648_v17 = vpop.f32.mrb[26].mxu0  ;;  %801 = vmatprep.subr.bf16.mxu1 %v706_v11 }
 0x1b7   : > { %v649_v18 = vadd.f32 %v648_v17, %v433_v15  ;;  %v650_v19 = vpop.f32.mrb[27].mxu0  ;;  %802 = vmatpush1.bf16.msra.mxu1 %v705_v9  ;;  %v687_v21 = vmax.f32 %v645_v13, 0.0  ;;  %v760_v13 = vpop.permute.xlu0 %759 }
 0x1b8   : > { %v651_v20 = vadd.f32 %v650_v19, %v433_v15  ;;  %v688_v23 = vmax.f32 %v647_v16, 0.0  ;;  %v765_v17 = vpop.permute.xlu1 %764 }
 0x1b9   : > { %v689_v22 = vmax.f32 %v649_v18, 0.0 }
 0x1ba   : > { %v690_v24 = vmax.f32 %v651_v20, 0.0 }
 0x1bb   : > { %v707_v25 = vpack.c.bf16 %v689_v22, %v687_v21 }
 0x1bc   : > { %v708_v27 = vpack.c.bf16 %v690_v24, %v688_v23  ;;  %v654_v28 = vpop.f32.mrb[28].mxu0 }
 0x1bd   : > { %v655_v29 = vadd.f32 %v654_v28, %v438_v26  ;;  %v656_v30 = vpop.f32.mrb[29].mxu0 }
 0x1be   : > { %v657_v32 = vadd.f32 %v656_v30, %v438_v26  ;;  %v658_v33 = vpop.f32.mrb[30].mxu0  ;;  %803 = vmatprep.subr.bf16.mxu1 %v708_v27 }
 0x1bf   : > { %v659_v34 = vadd.f32 %v658_v33, %v443_v31  ;;  %v660_v35 = vpop.f32.mrb[31].mxu0  ;;  %804 = vmatpush1.bf16.msra.mxu1 %v707_v25  ;;  %v691_v37 = vmax.f32 %v655_v29, 0.0 }
 0x1c0   : > { %v661_v36 = vadd.f32 %v660_v35, %v443_v31  ;;  %v692_v39 = vmax.f32 %v657_v32, 0.0 }
 0x1c1   : > { %v693_v38 = vmax.f32 %v659_v34, 0.0 }
 0x1c2   : > { %v694_v40 = vmax.f32 %v661_v36, 0.0 }
 0x1c3   : > { %v709_v41 = vpack.c.bf16 %v693_v38, %v691_v37 }
 0x1c4   : > { %v710_v42 = vpack.c.bf16 %v694_v40, %v692_v39 }
 0x1c6   : > { %805 = vmatprep.subr.bf16.mxu1 %v710_v42 }
 0x1c7   : > { %806 = vmatpush1.bf16.msra.mxu1 %v709_v41 }
 0x1ca   : > { %824 = vmatmul.mubr.bf16.vlgmr.msra.gmra.mrb[0].mxu1 %v1211_v43 }
 0x1cb   : > { %833 = vmatprep.mubr.bf16.mxu1 %v1458_v0 }
 0x1d2   : > { %834 = vmatmul.mubr.bf16.gmra.mrb[4].mxu1 %v1212_v44 }
 0x1d3   : > { %843 = vmatprep.mubr.bf16.mxu1 %v1458_v0 }
 0x1da   : > { %844 = vmatmul.mubr.bf16.gmra.mrb[8].mxu1 %v1213_v45 }
 0x1db   : > { %853 = vmatprep.mubr.bf16.mxu1 %v1458_v0 }
 0x1e2   : > { %854 = vmatmul.mubr.bf16.gmra.mrb[12].mxu1 %v1214_v46 }
 0x29d   : > { %v825_v48 = vpop.f32.mrb[0].mxu1 }
 0x29e   : > { %v826_v49 = vadd.f32 %v825_v48, %v730_v47  ;;  %v827_v50 = vpop.f32.mrb[1].mxu1 }
 0x29f   : > { %v828_v52 = vadd.f32 %v827_v50, %v730_v47  ;;  %v829_v53 = vpop.f32.mrb[2].mxu1 }
 0x2a0   : > { %864 = vst [vmem:[%s1767_s28] sm:$0xff] %v826_v49  ;;  %v830_v54 = vadd.f32 %v829_v53, %v735_v51  ;;  %v831_v0 = vpop.f32.mrb[3].mxu1 }
 0x2a1   : > { %865 = vst [vmem:[%s1767_s28 + $0x8] sm:$0xff] %v828_v52  ;;  %v832_v55 = vadd.f32 %v831_v0, %v735_v51 }
 0x2a2   : > { %866 = vst [vmem:[%s1767_s28 + $0x10] sm:$0xff] %v830_v54 }
 0x2a3   : > { %867 = vst [vmem:[%s1767_s28 + $0x18] sm:$0xff] %v832_v55 }
 0x2a5   : > { %v835_v57 = vpop.f32.mrb[4].mxu1 }
 0x2a6   : > { %v836_v58 = vadd.f32 %v835_v57, %v740_v56  ;;  %v837_v59 = vpop.f32.mrb[5].mxu1 }
 0x2a7   : > { %v838_v61 = vadd.f32 %v837_v59, %v740_v56  ;;  %v839_v62 = vpop.f32.mrb[6].mxu1 }
 0x2a8   : > { %868 = vst [vmem:[%s1767_s28 + $0x20] sm:$0xff] %v836_v58  ;;  %v840_v63 = vadd.f32 %v839_v62, %v745_v60  ;;  %v841_v1 = vpop.f32.mrb[7].mxu1 }
 0x2a9   : > { %869 = vst [vmem:[%s1767_s28 + $0x28] sm:$0xff] %v838_v61  ;;  %v842_v2 = vadd.f32 %v841_v1, %v745_v60 }
 0x2aa   : > { %870 = vst [vmem:[%s1767_s28 + $0x30] sm:$0xff] %v840_v63 }
 0x2ab   : > { %871 = vst [vmem:[%s1767_s28 + $0x38] sm:$0xff] %v842_v2 }
 0x2ad   : > { %v845_v4 = vpop.f32.mrb[8].mxu1 }
 0x2ae   : > { %v846_v5 = vadd.f32 %v845_v4, %v750_v3  ;;  %v847_v6 = vpop.f32.mrb[9].mxu1 }
 0x2af   : > { %v848_v8 = vadd.f32 %v847_v6, %v750_v3  ;;  %v849_v9 = vpop.f32.mrb[10].mxu1 }
 0x2b0   : > { %872 = vst [vmem:[%s1767_s28 + $0x40] sm:$0xff] %v846_v5  ;;  %v850_v10 = vadd.f32 %v849_v9, %v755_v7  ;;  %v851_v11 = vpop.f32.mrb[11].mxu1 }
 0x2b1   : > { %873 = vst [vmem:[%s1767_s28 + $0x48] sm:$0xff] %v848_v8  ;;  %v852_v12 = vadd.f32 %v851_v11, %v755_v7 }
 0x2b2   : > { %874 = vst [vmem:[%s1767_s28 + $0x50] sm:$0xff] %v850_v10 }
 0x2b3   : > { %875 = vst [vmem:[%s1767_s28 + $0x58] sm:$0xff] %v852_v12 }
 0x2b5   : > { %v855_v14 = vpop.f32.mrb[12].mxu1 }
 0x2b6   : > { %v856_v15 = vadd.f32 %v855_v14, %v760_v13  ;;  %v857_v16 = vpop.f32.mrb[13].mxu1 }
 0x2b7   : > { %v858_v18 = vadd.f32 %v857_v16, %v760_v13  ;;  %v859_v19 = vpop.f32.mrb[14].mxu1 }
 0x2b8   : > { %876 = vst [vmem:[%s1767_s28 + $0x60] sm:$0xff] %v856_v15  ;;  %v860_v20 = vadd.f32 %v859_v19, %v765_v17  ;;  %v861_v21 = vpop.f32.mrb[15].mxu1 }
 0x2b9   : > { %877 = vst [vmem:[%s1767_s28 + $0x68] sm:$0xff] %v858_v18  ;;  %v862_v22 = vadd.f32 %v861_v21, %v765_v17 }
 0x2ba   : > { %878 = vst [vmem:[%s1767_s28 + $0x70] sm:$0xff] %v860_v20 }
 0x2bb   : > { %879 = vst [vmem:[%s1767_s28 + $0x78] sm:$0xff] %v862_v22 }
 0x2bc   : > { %1370 = shalt.err (!%p1367_p0)
}
 0x2bd   : > { %s1371_s15 = scalar_lea.hbm %s1787_s12, 2048  ;;  %s1375_s6 = scalar_lea.hbm %s1846_s5, 4096 }
 0x2be   : > { %p1372_p4 = scmp.ne.s32.totalorder %s1787_s12, %s1371_s15  ;;  %p1376_p12 = scmp.lt.u32.totalorder %s1787_s12, %s1846_s5 }
 0x2bf   : > { %p1377_p1 = scmp.lt.u32.totalorder %s1375_s6, %s1371_s15  ;;  %p1379_p11 = scmp.lt.u32.totalorder %s1371_s15, %s1787_s12 }
 0x2c0   : > { %p1373_p13 = pnand %p1372_p4, %p1670_p5 }
 0x2c1   : > { %p1378_p8 = por %p1377_p1, %p1376_p12 }
 0x2c2   : > { %p1374_p2 = pneg %p1373_p13 }
 0x2c3   : > { %p1380_p6 = por %p1379_p11, %p1378_p8 }
 0x2c5   : > { %p1381_p10 = pnand %p1380_p6, %p1374_p2 }
 0x2c7   : > { %1384 = shalt.err (!%p1381_p10)
}
 0x2c8   : > { %s1460_s28 = smov 256   ;;  %s1461_s30 = smov 16  }
 0x2c9   : > { %1097 = dma.vmem_to_hbm [thread:$0]  (%p1670_p5), %s1789_s10, 2048, %s1787_s12, %s881_s21, %s1460_s28, %s1460_s28, %s1461_s30  }
 0x2ca PF: > { %s1868_s11 = sld [smem:[#allocation16_spill]]  ;;  %s1869_s7 = sld [smem:[#allocation17_spill]] }
 0x2cb   : > { %p1871_p7 = scmp.ge.s32.totalorder %s1447_s23, 2 }
 0x2d0   : > { %s912_s13 = sand.u32 1, %s1868_s11   ;;  %p1870_p3 = scmp.ne.s32.totalorder %s1869_s7, 0 }
 0x2d1   : > { %s913_s18 = scalar_lea.sflag [#allocation4], %s912_s13 }
 0x2d2   : > { %p1117_p9 = pnand %p1871_p7, %p1870_p3 }
 0x2d4   : > { %1422 = dma.done.wait (!%p1117_p9), %s913_s18, 2048  }
 0x2d5   : > { %1424 = vsyncadd (!%p1117_p9), %s913_s18, 4294965248  ;;  %s23_s23 = sadd.s32 1, %s1447_s23   ;;  %s1872_s18 = smov %s1431_s19 }
 0x2d6   : > { %p20_p0 = scmp.ge.s32.totalorder %s23_s23, 4   ;;  %s1873_s19 = smov %s1435_s20 }
 0x2d7   : > { %s1874_s20 = smov %s1679_s25  ;;  %s1875_s21 = smov %s1443_s22 }
 0x2d8   : > { %s1876_s22 = smov %s1878_s24  ;;  %22 = sbr.rel (!%p20_p0) target bundleno = 8 (0x8), region = 101 }
 0x2df   :  { %918 = vsyncpa [#allocation3], 1 }
 0x2e0   :  { %920 = vsyncpa [#allocation3 + $0x1], 1 }
 0x2e1   :  { %921 = vsyncpa [#allocation6], 1 }
 0x2e2   :  { %922 = vsyncpa [#allocation9], 1 }
 0x2e3   :  { %923 = vsyncpa [#allocation4], 1 }
 0x2e4   :  { %925 = vsyncpa [#allocation4 + $0x1], 1 }

// kernel: tpu_custom_call.1
= control target key start
LH: loop header
LB: loop body
LE: loop exit
PB: predicated region body
PF: predicated region fallthrough
CT: control target
= control target key end

     0   :  { %10 = vsyncpa [#allocation3], 0  ;;  %s1841_s0 = inlined_call_operand.hbm [shape: bf16[128,256], index: 0, kind: input, shape index: {}]   ;;  %s1842_s1 = inlined_call_operand.hbm [shape: bf16[128,64], index: 1, kind: input, shape index: {}]   ;;  %s1843_s2 = inlined_call_operand.hbm [shape: f32[128,1], index: 2, kind: input, shape index: {}]   ;;  %s1844_s3 = inlined_call_operand.hbm [shape: bf16[64,128], index: 3, kind: input, shape index: {}]   ;;  %s1845_s4 = inlined_call_operand.hbm [shape: f32[64,1], index: 4, kind: input, shape index: {}]   ;;  %s1846_s5 = inlined_call_operand.hbm [shape: f32[128,256], index: 5, kind: output, shape index: {}]  }
   0x1   :  { %12 = vsyncpa [#allocation3 + $0x1], 0 }
   0x2   :  { %13 = vsyncpa [#allocation6], 0 }
   0x3   :  { %14 = vsyncpa [#allocation9], 0 }
   0x4   :  { %15 = vsyncpa [#allocation4], 0 }
   0x5   :  { %17 = vsyncpa [#allocation4 + $0x1], 0  ;;  %s1492_s18 = smov 0   ;;  %s1494_s19 = smov 0  }
   0x6   :  { %s1496_s20 = smov 0   ;;  %s1498_s21 = smov 0  }
   0x7   :  { %s1500_s22 = smov 0   ;;  %s1502_s23 = smov 0  }
   0x8 LB: > { %1853 = sst [smem:[#allocation16_spill]] %s1427_s18  ;;  %s1022_s24 = sadd.s32 4294967295, %s1447_s23   ;;  %s1447_s23 = sphi %s1502_s23, %s23_s23   ;;  %s1443_s22 = sphi %s1500_s22, %s1876_s22   ;;  %s1439_s21 = sphi %s1498_s21, %s1875_s21   ;;  %s1435_s20 = sphi %s1496_s20, %s1874_s20   ;;  %s1431_s19 = sphi %s1494_s19, %s1873_s19   ;;  %s1427_s18 = sphi %s1492_s18, %s1872_s18  }
   0x9   : > { %s1023_s25 = sadd.s32 4294967294, %s1447_s23   ;;  %p57_p0 = scmp.ne.s32.totalorder %s1431_s19, %s1427_s18 }
   0xa   : > { %p1526_p1 = scmp.eq.s32.totalorder %s1022_s24, 0  ;;  %p1530_p2 = scmp.eq.s32.totalorder %s1022_s24, 1 }
   0xb   : > { %p173_p3 = scmp.eq.s32.totalorder %s1023_s25, 1  ;;  %p1024_p5 = scmp.ge.s32.totalorder %s1447_s23, 1 }
   0xc   : > { %s1854_s26 = scalar_select %p1526_p1, 1, 0 }
   0xd   : > { %s1855_s27 = scalar_select %p1530_p2, 1, 0 }
   0xe   : > { %p1536_p4 = por %p1526_p1, %p57_p0  ;;  %p1541_p6 = por %p173_p3, %p57_p0 }
   0xf   : > { %p180_p7 = scmp.lt.s32.totalorder %s1447_s23, 3  ;;  %s1449_s6 = smov [#allocation5]  }
  0x10   : > { %s1856_s28 = scalar_select %p1536_p4, 1, 0 }
  0x11   : > { %s1857_s29 = scalar_select %p1541_p6, 1, 0 }
  0x12   : > { %p1546_p8 = pnand %p1024_p5, %p180_p7  ;;  %s192_s7 = sshll.u32 %s1449_s6, 4  ;;  %s1550_s7 = int_to_ptr.vmem [resolvable:$true] %s192_s7 }
  0x13   : > { %1858 = sst [smem:[#allocation17_spill]] %s1857_s29  ;;  %s1450_s9 = smov [#allocation8]  }
  0x14   : > { %s1859_s30 = scalar_select %p1546_p8, 1, 0 }
  0x15   : > { %p1099_p9 = pneg %p1546_p8  ;;  %s218_s10 = sshll.u32 %s1450_s9, 4  ;;  %s1561_s10 = int_to_ptr.vmem [resolvable:$true] %s218_s10 }
  0x16   : > { %s1451_s11 = smov [#allocation7]   ;;  %s1215_s15 = scalar_lea.hbm %s1842_s1, 1024 }
  0x17   : > { %p1557_p11 = pnand %p1099_p9, %p1526_p1  ;;  %s1563_s12 = sshll.u32 %s1451_s11, 4  ;;  %s206_s12 = int_to_ptr.vmem [resolvable:$true] %s1563_s12 }
  0x18   : > { %p1216_p12 = scmp.ne.s32.totalorder %s1842_s1, %s1215_s15  ;;  %p1222_p5 = scmp.lt.u32.totalorder %s1215_s15, %s1842_s1 }
  0x19   : > { %p1573_p13 = pneg %p1557_p11 }
  0x1b   : > { %p1218_p0 = pnand %p1573_p13, %p1216_p12 }
  0x1d   : > { %p1219_p3 = pneg %p1218_p0 }
  0x1f   : > { %p1224_p7 = pnand %p1222_p5, %p1219_p3 }
  0x21   : > { %1227 = shalt.err (!%p1224_p7)
}
  0x22   : > { %s1228_s9 = scalar_lea.vmem %s1550_s7, 1024  ;;  %p1236_p1 = scmp.lt.s32.totalorder %s1550_s7, %s1550_s7 }
  0x23   : > { %p1229_p9 = scmp.ne.s32.totalorder %s1550_s7, %s1228_s9  ;;  %p1237_p4 = scmp.lt.s32.totalorder %s1228_s9, %s1228_s9 }
  0x25   : > { %p1231_p10 = pnand %p1229_p9, %p1573_p13  ;;  %p1238_p12 = por %p1237_p4, %p1236_p1 }
  0x27   : > { %p1232_p6 = pneg %p1231_p10 }
  0x29   : > { %p1239_p0 = pnand %p1238_p12, %p1232_p6 }
  0x2b   : > { %1242 = shalt.err (!%p1239_p0)
}
  0x2c   : > { %s1452_s11 = smov 64   ;;  %s1453_s13 = smov 4  }
  0x2d   : > { %1102 = dma.hbm_to_vmem [thread:$0]  (!%p1557_p11), %s1842_s1, 1024, %s1550_s7, [#allocation6], %s1452_s11, %s1452_s11, %s1453_s13  }
  0x2e   : > { %s1243_s25 = scalar_lea.hbm %s1844_s3, 512 }
  0x2f   : > { %p1244_p1 = scmp.ne.s32.totalorder %s1844_s3, %s1243_s25  ;;  %p1250_p10 = scmp.lt.u32.totalorder %s1243_s25, %s1844_s3 }
  0x31   : > { %p1246_p4 = pnand %p1244_p1, %p1573_p13 }
  0x33   : > { %p1247_p6 = pneg %p1246_p4 }
  0x35   : > { %p1252_p3 = pnand %p1250_p10, %p1247_p6 }
  0x37   : > { %1255 = shalt.err (!%p1252_p3)
}
  0x38   : > { %s1256_s7 = scalar_lea.vmem %s1561_s10, 512  ;;  %p1264_p12 = scmp.lt.s32.totalorder %s1561_s10, %s1561_s10 }
  0x39   : > { %p1257_p5 = scmp.ne.s32.totalorder %s1561_s10, %s1256_s7  ;;  %p1265_p0 = scmp.lt.s32.totalorder %s1256_s7, %s1256_s7 }
  0x3b   : > { %p1259_p7 = pnand %p1257_p5, %p1573_p13  ;;  %p1266_p1 = por %p1265_p0, %p1264_p12 }
  0x3d   : > { %p1260_p9 = pneg %p1259_p7 }
  0x3f   : > { %p1267_p4 = pnand %p1266_p1, %p1260_p9 }
  0x41   : > { %1270 = shalt.err (!%p1267_p4)
}
  0x42   : > { %1108 = dma.hbm_to_vmem [thread:$0]  (!%p1557_p11), %s1844_s3, 512, %s1561_s10, [#allocation9], %s1452_s11, %s1452_s11, %s1453_s13  }
  0x43   : > { %s1271_s16 = scalar_lea.hbm %s1843_s2, 2048 }
  0x44   : > { %p1272_p6 = scmp.ne.s32.totalorder %s1843_s2, %s1271_s16  ;;  %p1278_p5 = scmp.lt.u32.totalorder %s1271_s16, %s1843_s2 }
  0x46   : > { %p1274_p10 = pnand %p1272_p6, %p1573_p13 }
  0x48   : > { %p1275_p3 = pneg %p1274_p10 }
  0x4a   : > { %p1280_p7 = pnand %p1278_p5, %p1275_p3 }
  0x4c   : > { %1283 = shalt.err (!%p1280_p7)
}
  0x4d   : > { %s1284_s7 = scalar_lea.vmem %s206_s12, 2048  ;;  %p1292_p1 = scmp.lt.s32.totalorder %s206_s12, %s206_s12 }
  0x4e   : > { %p1285_p9 = scmp.ne.s32.totalorder %s206_s12, %s1284_s7  ;;  %p1293_p4 = scmp.lt.s32.totalorder %s1284_s7, %s1284_s7 }
  0x50   : > { %p1287_p12 = pnand %p1285_p9, %p1573_p13  ;;  %p1294_p8 = por %p1293_p4, %p1292_p1 }
  0x52   : > { %p1288_p0 = pneg %p1287_p12 }
  0x54   : > { %p1295_p2 = pnand %p1294_p8, %p1288_p0 }
  0x56   : > { %1298 = shalt.err (!%p1295_p2)
}
  0x57   : > { %s1454_s10 = smov 128   ;;  %s1455_s11 = smov 8  }
  0x58   : > { %1105 = dma.hbm_to_vmem [thread:$0]  (!%p1557_p11), %s1843_s2, 2048, %s206_s12, [#allocation6], %s1454_s10, %s1454_s10, %s1455_s11  }
  0x59   : > { %s1456_s29 = smov [#allocation10]   ;;  %s1299_s17 = scalar_lea.hbm %s1845_s4, 1024 }
  0x5a   : > { %s231_s14 = sshll.u32 %s1456_s29, 4  ;;  %p1300_p2 = scmp.ne.s32.totalorder %s1845_s4, %s1299_s17  ;;  %s232_s14 = int_to_ptr.vmem [resolvable:$true] %s231_s14 }
  0x5b   : > { %p1306_p10 = scmp.lt.u32.totalorder %s1299_s17, %s1845_s4 }
  0x5c   : > { %p1302_p8 = pnand %p1300_p2, %p1573_p13 }
  0x5e   : > { %p1303_p6 = pneg %p1302_p8 }
  0x60   : > { %p1308_p3 = pnand %p1306_p10, %p1303_p6 }
  0x62   : > { %1311 = shalt.err (!%p1308_p3)
}
  0x63   : > { %s1312_s12 = scalar_lea.vmem %s232_s14, 1024  ;;  %p1320_p12 = scmp.lt.s32.totalorder %s232_s14, %s232_s14 }
  0x64   : > { %p1313_p5 = scmp.ne.s32.totalorder %s232_s14, %s1312_s12  ;;  %p1321_p0 = scmp.lt.s32.totalorder %s1312_s12, %s1312_s12 }
  0x66   : > { %p1315_p7 = pnand %p1313_p5, %p1573_p13  ;;  %p1322_p1 = por %p1321_p0, %p1320_p12 }
  0x68   : > { %p1316_p9 = pneg %p1315_p7 }
  0x6a   : > { %p1323_p4 = pnand %p1322_p1, %p1316_p9 }
  0x6c   : > { %1326 = shalt.err (!%p1323_p4)
}
  0x6d   : > { %1111 = dma.hbm_to_vmem [thread:$0]  (!%p1557_p11), %s1845_s4, 1024, %s232_s14, [#allocation9], %s1454_s10, %s1454_s10, %s1455_s11  }
  0x6e   : > { %s35_s24 = sadd.s32 1, %s1443_s22  ;;  %s44_s8 = sadd.s32 1, %s1435_s20 }
  0x6f   : > { %p37_p13 = scmp.ge.s32.totalorder %s35_s24, 2  ;;  %p51_p2 = scmp.ne.s32.totalorder %s1435_s20, %s1431_s19 }
  0x70   : > { %p52_p8 = scmp.eq.s32.totalorder %s1447_s23, 0  ;;  %p1124_p6 = scmp.lt.s32.totalorder %s1447_s23, 2 }
  0x71   : > { %s1878_s24 = smov (%p37_p13, %s35_s24), 0  ;;  %p1862_p3 = scmp.ne.s32.totalorder %s1855_s27, 0 }
  0x72   : > { %p53_p10 = por %p52_p8, %p51_p2  ;;  %s39_s15 = ssub.s32 %s1443_s22, %s1878_s24 }
  0x73   : > { %p1670_p5 = por %p1862_p3, %p51_p2  ;;  %s245_s16 = sand.u32 1, %s1435_s20  }
  0x74   : > { %p42_p7 = scmp.eq.s32.totalorder %s39_s15, 0  ;;  %s1030_s14 = sshll.u32 %s245_s16, 6 }
  0x75   : > { %s1076_s17 = sshll.u32 %s1443_s22, 10  ;;  %s249_s27 = scalar_lea.vmem [#allocation2], %s1030_s14 }
  0x76   : > { %s1679_s25 = scalar_select %p42_p7, %s1435_s20, %s44_s8  }
  0x77   : > { %s1684_s7 = scalar_lea.hbm %s1841_s0, %s1076_s17  ;;  %s259_s12 = sshll.u32 %s249_s27, 4  ;;  %s1692_s12 = int_to_ptr.vmem [resolvable:$true] %s259_s12 }
  0x78   : > { %p1688_p11 = pnand %p1124_p6, %p53_p10  ;;  %s1694_s18 = scalar_lea.sflag [#allocation3], %s245_s16 }
  0x79   : > { %s1327_s8 = scalar_lea.hbm %s1684_s7, 1024  ;;  %s1332_s17 = scalar_lea.hbm %s1841_s0, 2048 }
  0x7a   : > { %p1328_p9 = scmp.ne.s32.totalorder %s1684_s7, %s1327_s8  ;;  %p1329_p12 = pneg %p1688_p11 }
  0x7b   : > { %p1333_p4 = scmp.lt.u32.totalorder %s1684_s7, %s1841_s0  ;;  %p1334_p13 = scmp.lt.u32.totalorder %s1332_s17, %s1327_s8 }
  0x7c   : > { %p1330_p0 = pnand %p1329_p12, %p1328_p9  ;;  %p1336_p8 = scmp.lt.u32.totalorder %s1327_s8, %s1684_s7 }
  0x7d   : > { %p1335_p2 = por %p1334_p13, %p1333_p4 }
  0x7e   : > { %p1331_p1 = pneg %p1330_p0 }
  0x7f   : > { %p1337_p6 = por %p1336_p8, %p1335_p2 }
  0x81   : > { %p1338_p10 = pnand %p1337_p6, %p1331_p1 }
  0x83   : > { %1341 = shalt.err (!%p1338_p10)
}
  0x84   : > { %s1342_s16 = scalar_lea.vmem %s1692_s12, 1024  ;;  %s1457_s27 = smov [#allocation2]  }
  0x85   : > { %p1343_p3 = scmp.ne.s32.totalorder %s1692_s12, %s1342_s16  ;;  %s1347_s15 = sshll.u32 %s1457_s27, 4  ;;  %s1348_s15 = int_to_ptr.vmem [resolvable:$false] %s1347_s15 }
  0x86   : > { %s1349_s14 = scalar_lea.vmem %s1348_s15, 2048  ;;  %p1350_p0 = scmp.lt.s32.totalorder %s1692_s12, %s1348_s15 }
  0x87   : > { %p1345_p7 = pnand %p1343_p3, %p1329_p12  ;;  %p1351_p4 = scmp.lt.s32.totalorder %s1349_s14, %s1342_s16 }
  0x89   : > { %p1346_p9 = pneg %p1345_p7  ;;  %p1352_p13 = por %p1351_p4, %p1350_p0 }
  0x8b   : > { %p1353_p2 = pnand %p1352_p13, %p1346_p9 }
  0x8d   : > { %1356 = shalt.err (!%p1353_p2)
}
  0x8e   : > { %1115 = dma.hbm_to_vmem [thread:$0]  (!%p1688_p11), %s1684_s7, 1024, %s1692_s12, %s1694_s18, %s1454_s10, %s1454_s10, %s1455_s11  }
  0x8f   : > { %p1865_p12 = scmp.ne.s32.totalorder %s1859_s30, 0 }
  0x90   : > { %s1728_s8 = sand.u32 (!%p1865_p12), 1, %s1431_s19   ;;  %p1866_p1 = scmp.ne.s32.totalorder (!%p1865_p12), %s1856_s28, 0 }
  0x91   : > { %271 = sbr.rel (%p1865_p12) target bundleno = 714 (0x2ca), region = 40  ;;  %s1035_s17 = sshll.u32 (!%p1865_p12), %s1728_s8, 6 }
  0x92   : > { %s274_s6 = scalar_lea.sflag (!%p1865_p12), [#allocation3], %s1728_s8  ;;  %s277_s9 = scalar_lea.vmem (!%p1865_p12), [#allocation2], %s1035_s17 }
  0x98   : > { %1410 = dma.done.wait (%p1866_p1), %s274_s6, 1024  }
  0x99   : > { %1412 = vsyncadd (%p1866_p1), %s274_s6, 4294966272  ;;  %p1867_p8 = scmp.ne.s32.totalorder %s1854_s26, 0 }
  0x9b   : > { %1414 = dma.done.wait (%p1867_p8), [#allocation6], 3072  }
  0x9c   : > { %1416 = vsyncadd (%p1867_p8), [#allocation6], 4294964224 }
  0x9d   : > { %1418 = dma.done.wait (%p1867_p8), [#allocation9], 1536  }
  0x9e   : > { %1420 = vsyncadd (%p1867_p8), [#allocation9], 4294965760  ;;  %v1458_v0 = vmov 0   ;;  %v1191_v1 = vld [vmem:[%s277_s9 + $0x4] ss:$8 sps:$4 sm:$0xff]   ;;  %v351_v10 = vld [vmem:[#allocation7 + $0x10] sm:$0xff] }
  0x9f   : > { %582 = vmatprep.mubr.bf16.mxu0 %v1458_v0  ;;  %1189 = vset.pattern.permute.xlu0 %v1458_v0  ;;  %v1193_v2 = vld [vmem:[%s277_s9] ss:$8 sps:$4 sm:$0xff]   ;;  %v1194_v3 = vld [vmem:[%s277_s9 + $0x14] ss:$8 sps:$4 sm:$0xff]   ;;  %v1196_v4 = vld [vmem:[%s277_s9 + $0x10] ss:$8 sps:$4 sm:$0xff]  }
  0xa0   : > { %1190 = vset.pattern.permute.xlu1 %v1458_v0  ;;  %823 = vmatprep.mubr.bf16.mxu1 %v1458_v0  ;;  %v1197_v5 = vld [vmem:[%s277_s9 + $0x24] ss:$8 sps:$4 sm:$0xff]   ;;  %v1199_v6 = vld [vmem:[%s277_s9 + $0x20] ss:$8 sps:$4 sm:$0xff]   ;;  %v1200_v7 = vld [vmem:[%s277_s9 + $0x34] ss:$8 sps:$4 sm:$0xff]  }
  0xa1   : > { %550 = vmatprep.subr.bf16.mxu0 %v1191_v1  ;;  %v1202_v8 = vld [vmem:[%s277_s9 + $0x30] ss:$8 sps:$4 sm:$0xff]   ;;  %v349_v9 = vld [vmem:[#allocation7] sm:$0xff]  ;;  %377 = vperm.xlu1 %1190, %v351_v10   ;;  %vm525_vm0 = vcmask 523264   ;;  %v350_v12 = vld [vmem:[#allocation7 + $0x8] sm:$0xff]  ;;  %s1040_s26 = sshll.u32 %s1728_s8, 7 }
  0xa2   : > { %551 = vmatpush1.bf16.msra.mxu0 %v1193_v2  ;;  %v1203_v11 = vld [vmem:[#allocation5] sm:$0xff]   ;;  %367 = vperm.xlu0 %1189, %v349_v9   ;;  %v352_v13 = vld [vmem:[#allocation7 + $0x18] sm:$0xff]  ;;  %v1204_v15 = vld [vmem:[#allocation5 + $0x8] sm:$0xff]   ;;  %s1767_s28 = scalar_lea.vmem [#allocation11], %s1040_s26  ;;  %s1078_s30 = sshll.u32 %s1439_s21, 11 }
  0xa3   : > { %552 = vmatprep.subr.bf16.mxu0 %v1194_v3  ;;  %v353_v14 = vld [vmem:[#allocation7 + $0x20] sm:$0xff]  ;;  %v354_v16 = vld [vmem:[#allocation7 + $0x28] sm:$0xff]  ;;  %v355_v17 = vld [vmem:[#allocation7 + $0x30] sm:$0xff]  ;;  %s897_s10 = sshll.u32 %s1767_s28, 4  ;;  %s1787_s12 = scalar_lea.hbm %s1846_s5, %s1078_s30  ;;  %s1789_s10 = int_to_ptr.vmem [resolvable:$true] %s897_s10 }
  0xa4   : > { %v356_v18 = vld [vmem:[#allocation7 + $0x38] sm:$0xff]  ;;  %v357_v19 = vld [vmem:[#allocation7 + $0x40] sm:$0xff]  ;;  %v358_v20 = vld [vmem:[#allocation7 + $0x48] sm:$0xff]  ;;  %s881_s21 = scalar_lea.sflag [#allocation4], %s1728_s8  ;;  %s1357_s13 = scalar_lea.vmem %s1789_s10, 2048 }
  0xa5   : > { %382 = vperm.xlu1 %1190, %v352_v13   ;;  %v1205_v21 = vld [vmem:[#allocation5 + $0x10] sm:$0xff]   ;;  %v360_v23 = vld [vmem:[#allocation7 + $0x58] sm:$0xff]  ;;  %v361_v24 = vld [vmem:[#allocation7 + $0x60] sm:$0xff]  ;;  %p1358_p11 = scmp.ne.s32.totalorder %s1789_s10, %s1357_s13  ;;  %s1459_s18 = smov [#allocation11]  }
  0xa6   : > { %553 = vmatpush1.bf16.msra.mxu0 %v1196_v4  ;;  %372 = vperm.xlu0 %1189, %v350_v12   ;;  %v359_v22 = vld [vmem:[#allocation7 + $0x50] sm:$0xff]  ;;  %v362_v25 = vld [vmem:[#allocation7 + $0x68] sm:$0xff]  ;;  %v1206_v26 = vld [vmem:[#allocation5 + $0x18] sm:$0xff]   ;;  %s1361_s16 = sshll.u32 %s1459_s18, 4  ;;  %s1362_s16 = int_to_ptr.vmem [resolvable:$false] %s1361_s16 }
  0xa7   : > { %554 = vmatprep.subr.bf16.mxu0 %v1197_v5  ;;  %v363_v27 = vld [vmem:[#allocation7 + $0x70] sm:$0xff]  ;;  %v364_v28 = vld [vmem:[#allocation7 + $0x78] sm:$0xff]  ;;  %v719_v29 = vld [vmem:[#allocation10] sm:$0xff]  ;;  %p1359_p6 = pnand %p1358_p11, %p1670_p5  ;;  %s1363_s27 = scalar_lea.vmem %s1362_s16, 4096 }
  0xa8   : > { %v720_v30 = vld [vmem:[#allocation10 + $0x8] sm:$0xff]  ;;  %v1207_v31 = vld [vmem:[#allocation5 + $0x20] sm:$0xff]   ;;  %v721_v32 = vld [vmem:[#allocation10 + $0x10] sm:$0xff]  ;;  %p1364_p3 = scmp.lt.s32.totalorder %s1789_s10, %s1362_s16  ;;  %p1365_p7 = scmp.lt.s32.totalorder %s1363_s27, %s1357_s13 }
  0xa9   : > { %392 = vperm.xlu1 %1190, %v354_v16   ;;  %v722_v33 = vld [vmem:[#allocation10 + $0x18] sm:$0xff]  ;;  %v723_v34 = vld [vmem:[#allocation10 + $0x20] sm:$0xff]  ;;  %v724_v35 = vld [vmem:[#allocation10 + $0x28] sm:$0xff]  ;;  %p1360_p10 = pneg %p1359_p6 }
  0xaa   : > { %555 = vmatpush1.bf16.msra.mxu0 %v1199_v6  ;;  %387 = vperm.xlu0 %1189, %v353_v14   ;;  %v1208_v36 = vld [vmem:[#allocation5 + $0x28] sm:$0xff]   ;;  %v725_v37 = vld [vmem:[#allocation10 + $0x30] sm:$0xff]  ;;  %v726_v38 = vld [vmem:[#allocation10 + $0x38] sm:$0xff]  ;;  %p1366_p9 = por %p1365_p7, %p1364_p3 }
  0xab   : > { %556 = vmatprep.subr.bf16.mxu0 %v1200_v7  ;;  %v1209_v39 = vld [vmem:[#allocation5 + $0x30] sm:$0xff]   ;;  %v1210_v40 = vld [vmem:[#allocation5 + $0x38] sm:$0xff]  }
  0xac   : > { %p1367_p0 = pnand %p1366_p9, %p1360_p10 }
  0xad   : > { %402 = vperm.xlu1 %1190, %v356_v18  }
  0xae   : > { %557 = vmatpush1.bf16.msra.mxu0 %v1202_v8  ;;  %397 = vperm.xlu0 %1189, %v355_v17  }
  0xb1   : > { %1057 = vmatmul.mubr.msk.bf16.vlgmr.msra.gmra.mrb[0].mxu0 %vm525_vm0, %v1203_v11  ;;  %412 = vperm.xlu1 %1190, %v358_v20  }
  0xb2   : > { %592 = vmatprep.mubr.bf16.mxu0 %v1458_v0  ;;  %407 = vperm.xlu0 %1189, %v357_v19  }
  0xb5   : > { %422 = vperm.xlu1 %1190, %v360_v23  }
  0xb6   : > { %417 = vperm.xlu0 %1189, %v359_v22  }
  0xb9   : > { %1058 = vmatmul.mubr.msk.bf16.gmra.mrb[4].mxu0 %vm525_vm0, %v1204_v15  ;;  %432 = vperm.xlu1 %1190, %v362_v25  }
  0xba   : > { %602 = vmatprep.mubr.bf16.mxu0 %v1458_v0  ;;  %427 = vperm.xlu0 %1189, %v361_v24  }
  0xbd   : > { %442 = vperm.xlu1 %1190, %v364_v28  }
  0xbe   : > { %437 = vperm.xlu0 %1189, %v363_v27  }
  0xc1   : > { %1059 = vmatmul.mubr.msk.bf16.gmra.mrb[8].mxu0 %vm525_vm0, %v1205_v21  ;;  %734 = vperm.xlu1 %1190, %v720_v30  }
  0xc2   : > { %612 = vmatprep.mubr.bf16.mxu0 %v1458_v0  ;;  %729 = vperm.xlu0 %1189, %v719_v29  }
  0xc5   : > { %744 = vperm.xlu1 %1190, %v722_v33  }
  0xc6   : > { %739 = vperm.xlu0 %1189, %v721_v32  }
  0xc9   : > { %1060 = vmatmul.mubr.msk.bf16.gmra.mrb[12].mxu0 %vm525_vm0, %v1206_v26  ;;  %754 = vperm.xlu1 %1190, %v724_v35  }
  0xca   : > { %622 = vmatprep.mubr.bf16.mxu0 %v1458_v0  ;;  %749 = vperm.xlu0 %1189, %v723_v34  }
  0xcd   : > { %764 = vperm.xlu1 %1190, %v726_v38  }
  0xce   : > { %759 = vperm.xlu0 %1189, %v725_v37  }
  0xd1   : > { %1061 = vmatmul.mubr.msk.bf16.gmra.mrb[16].mxu0 %vm525_vm0, %v1207_v31 }
  0xd2   : > { %632 = vmatprep.mubr.bf16.mxu0 %v1458_v0 }
  0xd9   : > { %1062 = vmatmul.mubr.msk.bf16.gmra.mrb[20].mxu0 %vm525_vm0, %v1208_v36 }
  0xda   : > { %642 = vmatprep.mubr.bf16.mxu0 %v1458_v0 }
  0xe1   : > { %1063 = vmatmul.mubr.msk.bf16.gmra.mrb[24].mxu0 %vm525_vm0, %v1209_v39 }
  0xe2   : > { %652 = vmatprep.mubr.bf16.mxu0 %v1458_v0 }
  0xe9   : > { %1064 = vmatmul.mubr.msk.bf16.gmra.mrb[28].mxu0 %vm525_vm0, %v1210_v40 }
 0x120   : > { %v378_v50 = vpop.permute.xlu1 %377 }
 0x121   : > { %v368_v41 = vpop.permute.xlu0 %367 }
 0x124   : > { %v383_v61 = vpop.permute.xlu1 %382 }
 0x125   : > { %v373_v45 = vpop.permute.xlu0 %372 }
 0x128   : > { %v393_v14 = vpop.permute.xlu1 %392 }
 0x129   : > { %v388_v9 = vpop.permute.xlu0 %387 }
 0x12c   : > { %v403_v30 = vpop.permute.xlu1 %402 }
 0x12d   : > { %v398_v25 = vpop.permute.xlu0 %397 }
 0x184   : > { %v584_v42 = vpop.f32.mrb[0].mxu0 }
 0x185   : > { %v585_v43 = vadd.f32 %v584_v42, %v368_v41  ;;  %v586_v44 = vpop.f32.mrb[1].mxu0 }
 0x186   : > { %v587_v46 = vadd.f32 %v586_v44, %v368_v41  ;;  %v588_v47 = vpop.f32.mrb[2].mxu0  ;;  %v408_v41 = vpop.permute.xlu0 %407 }
 0x187   : > { %v589_v48 = vadd.f32 %v588_v47, %v373_v45  ;;  %v590_v49 = vpop.f32.mrb[3].mxu0  ;;  %v663_v52 = vmax.f32 %v585_v43, 0.0 }
 0x188   : > { %v591_v51 = vadd.f32 %v590_v49, %v373_v45  ;;  %v664_v54 = vmax.f32 %v587_v46, 0.0  ;;  %v413_v46 = vpop.permute.xlu1 %412 }
 0x189   : > { %v665_v53 = vmax.f32 %v589_v48, 0.0 }
 0x18a   : > { %v666_v55 = vmax.f32 %v591_v51, 0.0 }
 0x18b   : > { %v695_v56 = vpack.c.bf16 %v665_v53, %v663_v52 }
 0x18c   : > { %v594_v57 = vpop.f32.mrb[4].mxu0  ;;  %v696_v58 = vpack.c.bf16 %v666_v55, %v664_v54 }
 0x18d   : > { %v595_v59 = vadd.f32 %v594_v57, %v378_v50  ;;  %v596_v60 = vpop.f32.mrb[5].mxu0  ;;  %v418_v57 = vpop.permute.xlu0 %417 }
 0x18e   : > { %v597_v62 = vadd.f32 %v596_v60, %v378_v50  ;;  %v598_v63 = vpop.f32.mrb[6].mxu0  ;;  %791 = vmatprep.subr.bf16.mxu1 %v696_v58 }
 0x18f   : > { %v599_v1 = vadd.f32 %v598_v63, %v383_v61  ;;  %v600_v2 = vpop.f32.mrb[7].mxu0  ;;  %792 = vmatpush1.bf16.msra.mxu1 %v695_v56  ;;  %v667_v4 = vmax.f32 %v595_v59, 0.0 }
 0x190   : > { %v601_v3 = vadd.f32 %v600_v2, %v383_v61  ;;  %v668_v6 = vmax.f32 %v597_v62, 0.0  ;;  %v423_v62 = vpop.permute.xlu1 %422 }
 0x191   : > { %v669_v5 = vmax.f32 %v599_v1, 0.0 }
 0x192   : > { %v670_v7 = vmax.f32 %v601_v3, 0.0 }
 0x193   : > { %v697_v8 = vpack.c.bf16 %v669_v5, %v667_v4 }
 0x194   : > { %v698_v10 = vpack.c.bf16 %v670_v7, %v668_v6  ;;  %v604_v11 = vpop.f32.mrb[8].mxu0 }
 0x195   : > { %v605_v12 = vadd.f32 %v604_v11, %v388_v9  ;;  %v606_v13 = vpop.f32.mrb[9].mxu0 }
 0x196   : > { %v607_v15 = vadd.f32 %v606_v13, %v388_v9  ;;  %v608_v16 = vpop.f32.mrb[10].mxu0  ;;  %793 = vmatprep.subr.bf16.mxu1 %v698_v10  ;;  %v428_v10 = vpop.permute.xlu0 %427 }
 0x197   : > { %v609_v17 = vadd.f32 %v608_v16, %v393_v14  ;;  %v610_v18 = vpop.f32.mrb[11].mxu0  ;;  %794 = vmatpush1.bf16.msra.mxu1 %v697_v8  ;;  %v671_v20 = vmax.f32 %v605_v12, 0.0 }
 0x198   : > { %v611_v19 = vadd.f32 %v610_v18, %v393_v14  ;;  %v672_v22 = vmax.f32 %v607_v15, 0.0  ;;  %v433_v15 = vpop.permute.xlu1 %432 }
 0x199   : > { %v673_v21 = vmax.f32 %v609_v17, 0.0 }
 0x19a   : > { %v674_v23 = vmax.f32 %v611_v19, 0.0 }
 0x19b   : > { %v699_v24 = vpack.c.bf16 %v673_v21, %v671_v20 }
 0x19c   : > { %v700_v26 = vpack.c.bf16 %v674_v23, %v672_v22  ;;  %v614_v27 = vpop.f32.mrb[12].mxu0 }
 0x19d   : > { %v615_v28 = vadd.f32 %v614_v27, %v398_v25  ;;  %v616_v29 = vpop.f32.mrb[13].mxu0 }
 0x19e   : > { %v617_v31 = vadd.f32 %v616_v29, %v398_v25  ;;  %v618_v32 = vpop.f32.mrb[14].mxu0  ;;  %795 = vmatprep.subr.bf16.mxu1 %v700_v26  ;;  %v438_v26 = vpop.permute.xlu0 %437 }
 0x19f   : > { %v619_v33 = vadd.f32 %v618_v32, %v403_v30  ;;  %v620_v34 = vpop.f32.mrb[15].mxu0  ;;  %796 = vmatpush1.bf16.msra.mxu1 %v699_v24  ;;  %v675_v36 = vmax.f32 %v615_v28, 0.0 }
 0x1a0   : > { %v621_v35 = vadd.f32 %v620_v34, %v403_v30  ;;  %v676_v38 = vmax.f32 %v617_v31, 0.0  ;;  %v443_v31 = vpop.permute.xlu1 %442 }
 0x1a1   : > { %v677_v37 = vmax.f32 %v619_v33, 0.0 }
 0x1a2   : > { %v678_v39 = vmax.f32 %v621_v35, 0.0 }
 0x1a3   : > { %v701_v40 = vpack.c.bf16 %v677_v37, %v675_v36 }
 0x1a4   : > { %v702_v42 = vpack.c.bf16 %v678_v39, %v676_v38  ;;  %v624_v43 = vpop.f32.mrb[16].mxu0 }
 0x1a5   : > { %v625_v44 = vadd.f32 %v624_v43, %v408_v41  ;;  %v626_v45 = vpop.f32.mrb[17].mxu0  ;;  %v1211_v43 = vld [vmem:[#allocation8] sm:$0xff]  }
 0x1a6   : > { %v627_v47 = vadd.f32 %v626_v45, %v408_v41  ;;  %v628_v48 = vpop.f32.mrb[18].mxu0  ;;  %797 = vmatprep.subr.bf16.mxu1 %v702_v42  ;;  %v1213_v45 = vld [vmem:[#allocation8 + $0x10] sm:$0xff]  }
 0x1a7   : > { %v629_v49 = vadd.f32 %v628_v48, %v413_v46  ;;  %v630_v50 = vpop.f32.mrb[19].mxu0  ;;  %798 = vmatpush1.bf16.msra.mxu1 %v701_v40  ;;  %v679_v52 = vmax.f32 %v625_v44, 0.0  ;;  %v1212_v44 = vld [vmem:[#allocation8 + $0x8] sm:$0xff]  }
 0x1a8   : > { %v631_v51 = vadd.f32 %v630_v50, %v413_v46  ;;  %v680_v54 = vmax.f32 %v627_v47, 0.0  ;;  %v1214_v46 = vld [vmem:[#allocation8 + $0x18] sm:$0xff]   ;;  %v730_v47 = vpop.permute.xlu0 %729 }
 0x1a9   : > { %v681_v53 = vmax.f32 %v629_v49, 0.0 }
 0x1aa   : > { %v682_v55 = vmax.f32 %v631_v51, 0.0  ;;  %v735_v51 = vpop.permute.xlu1 %734 }
 0x1ab   : > { %v703_v56 = vpack.c.bf16 %v681_v53, %v679_v52 }
 0x1ac   : > { %v704_v58 = vpack.c.bf16 %v682_v55, %v680_v54  ;;  %v634_v59 = vpop.f32.mrb[20].mxu0 }
 0x1ad   : > { %v635_v60 = vadd.f32 %v634_v59, %v418_v57  ;;  %v636_v61 = vpop.f32.mrb[21].mxu0 }
 0x1ae   : > { %v637_v63 = vadd.f32 %v636_v61, %v418_v57  ;;  %v638_v1 = vpop.f32.mrb[22].mxu0  ;;  %799 = vmatprep.subr.bf16.mxu1 %v704_v58 }
 0x1af   : > { %v639_v2 = vadd.f32 %v638_v1, %v423_v62  ;;  %v640_v3 = vpop.f32.mrb[23].mxu0  ;;  %800 = vmatpush1.bf16.msra.mxu1 %v703_v56  ;;  %v683_v5 = vmax.f32 %v635_v60, 0.0  ;;  %v740_v56 = vpop.permute.xlu0 %739 }
 0x1b0   : > { %v641_v4 = vadd.f32 %v640_v3, %v423_v62  ;;  %v684_v7 = vmax.f32 %v637_v63, 0.0  ;;  %v745_v60 = vpop.permute.xlu1 %744 }
 0x1b1   : > { %v685_v6 = vmax.f32 %v639_v2, 0.0 }
 0x1b2   : > { %v686_v8 = vmax.f32 %v641_v4, 0.0 }
 0x1b3   : > { %v705_v9 = vpack.c.bf16 %v685_v6, %v683_v5  ;;  %v750_v3 = vpop.permute.xlu0 %749 }
 0x1b4   : > { %v706_v11 = vpack.c.bf16 %v686_v8, %v684_v7  ;;  %v644_v12 = vpop.f32.mrb[24].mxu0  ;;  %v755_v7 = vpop.permute.xlu1 %754 }
 0x1b5   : > { %v645_v13 = vadd.f32 %v644_v12, %v428_v10  ;;  %v646_v14 = vpop.f32.mrb[25].mxu0 }
 0x1b6   : > { %v647_v16 = vadd.f32 %v646_v14, %v428_v10  ;;  %v648_v17 = vpop.f32.mrb[26].mxu0  ;;  %801 = vmatprep.subr.bf16.mxu1 %v706_v11 }
 0x1b7   : > { %v649_v18 = vadd.f32 %v648_v17, %v433_v15  ;;  %v650_v19 = vpop.f32.mrb[27].mxu0  ;;  %802 = vmatpush1.bf16.msra.mxu1 %v705_v9  ;;  %v687_v21 = vmax.f32 %v645_v13, 0.0  ;;  %v760_v13 = vpop.permute.xlu0 %759 }
 0x1b8   : > { %v651_v20 = vadd.f32 %v650_v19, %v433_v15  ;;  %v688_v23 = vmax.f32 %v647_v16, 0.0  ;;  %v765_v17 = vpop.permute.xlu1 %764 }
 0x1b9   : > { %v689_v22 = vmax.f32 %v649_v18, 0.0 }
 0x1ba   : > { %v690_v24 = vmax.f32 %v651_v20, 0.0 }
 0x1bb   : > { %v707_v25 = vpack.c.bf16 %v689_v22, %v687_v21 }
 0x1bc   : > { %v708_v27 = vpack.c.bf16 %v690_v24, %v688_v23  ;;  %v654_v28 = vpop.f32.mrb[28].mxu0 }
 0x1bd   : > { %v655_v29 = vadd.f32 %v654_v28, %v438_v26  ;;  %v656_v30 = vpop.f32.mrb[29].mxu0 }
 0x1be   : > { %v657_v32 = vadd.f32 %v656_v30, %v438_v26  ;;  %v658_v33 = vpop.f32.mrb[30].mxu0  ;;  %803 = vmatprep.subr.bf16.mxu1 %v708_v27 }
 0x1bf   : > { %v659_v34 = vadd.f32 %v658_v33, %v443_v31  ;;  %v660_v35 = vpop.f32.mrb[31].mxu0  ;;  %804 = vmatpush1.bf16.msra.mxu1 %v707_v25  ;;  %v691_v37 = vmax.f32 %v655_v29, 0.0 }
 0x1c0   : > { %v661_v36 = vadd.f32 %v660_v35, %v443_v31  ;;  %v692_v39 = vmax.f32 %v657_v32, 0.0 }
 0x1c1   : > { %v693_v38 = vmax.f32 %v659_v34, 0.0 }
 0x1c2   : > { %v694_v40 = vmax.f32 %v661_v36, 0.0 }
 0x1c3   : > { %v709_v41 = vpack.c.bf16 %v693_v38, %v691_v37 }
 0x1c4   : > { %v710_v42 = vpack.c.bf16 %v694_v40, %v692_v39 }
 0x1c6   : > { %805 = vmatprep.subr.bf16.mxu1 %v710_v42 }
 0x1c7   : > { %806 = vmatpush1.bf16.msra.mxu1 %v709_v41 }
 0x1ca   : > { %824 = vmatmul.mubr.bf16.vlgmr.msra.gmra.mrb[0].mxu1 %v1211_v43 }
 0x1cb   : > { %833 = vmatprep.mubr.bf16.mxu1 %v1458_v0 }
 0x1d2   : > { %834 = vmatmul.mubr.bf16.gmra.mrb[4].mxu1 %v1212_v44 }
 0x1d3   : > { %843 = vmatprep.mubr.bf16.mxu1 %v1458_v0 }
 0x1da   : > { %844 = vmatmul.mubr.bf16.gmra.mrb[8].mxu1 %v1213_v45 }
 0x1db   : > { %853 = vmatprep.mubr.bf16.mxu1 %v1458_v0 }
 0x1e2   : > { %854 = vmatmul.mubr.bf16.gmra.mrb[12].mxu1 %v1214_v46 }
 0x29d   : > { %v825_v48 = vpop.f32.mrb[0].mxu1 }
 0x29e   : > { %v826_v49 = vadd.f32 %v825_v48, %v730_v47  ;;  %v827_v50 = vpop.f32.mrb[1].mxu1 }
 0x29f   : > { %v828_v52 = vadd.f32 %v827_v50, %v730_v47  ;;  %v829_v53 = vpop.f32.mrb[2].mxu1 }
 0x2a0   : > { %864 = vst [vmem:[%s1767_s28] sm:$0xff] %v826_v49  ;;  %v830_v54 = vadd.f32 %v829_v53, %v735_v51  ;;  %v831_v0 = vpop.f32.mrb[3].mxu1 }
 0x2a1   : > { %865 = vst [vmem:[%s1767_s28 + $0x8] sm:$0xff] %v828_v52  ;;  %v832_v55 = vadd.f32 %v831_v0, %v735_v51 }
 0x2a2   : > { %866 = vst [vmem:[%s1767_s28 + $0x10] sm:$0xff] %v830_v54 }
 0x2a3   : > { %867 = vst [vmem:[%s1767_s28 + $0x18] sm:$0xff] %v832_v55 }
 0x2a5   : > { %v835_v57 = vpop.f32.mrb[4].mxu1 }
 0x2a6   : > { %v836_v58 = vadd.f32 %v835_v57, %v740_v56  ;;  %v837_v59 = vpop.f32.mrb[5].mxu1 }
 0x2a7   : > { %v838_v61 = vadd.f32 %v837_v59, %v740_v56  ;;  %v839_v62 = vpop.f32.mrb[6].mxu1 }
 0x2a8   : > { %868 = vst [vmem:[%s1767_s28 + $0x20] sm:$0xff] %v836_v58  ;;  %v840_v63 = vadd.f32 %v839_v62, %v745_v60  ;;  %v841_v1 = vpop.f32.mrb[7].mxu1 }
 0x2a9   : > { %869 = vst [vmem:[%s1767_s28 + $0x28] sm:$0xff] %v838_v61  ;;  %v842_v2 = vadd.f32 %v841_v1, %v745_v60 }
 0x2aa   : > { %870 = vst [vmem:[%s1767_s28 + $0x30] sm:$0xff] %v840_v63 }
 0x2ab   : > { %871 = vst [vmem:[%s1767_s28 + $0x38] sm:$0xff] %v842_v2 }
 0x2ad   : > { %v845_v4 = vpop.f32.mrb[8].mxu1 }
 0x2ae   : > { %v846_v5 = vadd.f32 %v845_v4, %v750_v3  ;;  %v847_v6 = vpop.f32.mrb[9].mxu1 }
 0x2af   : > { %v848_v8 = vadd.f32 %v847_v6, %v750_v3  ;;  %v849_v9 = vpop.f32.mrb[10].mxu1 }
 0x2b0   : > { %872 = vst [vmem:[%s1767_s28 + $0x40] sm:$0xff] %v846_v5  ;;  %v850_v10 = vadd.f32 %v849_v9, %v755_v7  ;;  %v851_v11 = vpop.f32.mrb[11].mxu1 }
 0x2b1   : > { %873 = vst [vmem:[%s1767_s28 + $0x48] sm:$0xff] %v848_v8  ;;  %v852_v12 = vadd.f32 %v851_v11, %v755_v7 }
 0x2b2   : > { %874 = vst [vmem:[%s1767_s28 + $0x50] sm:$0xff] %v850_v10 }
 0x2b3   : > { %875 = vst [vmem:[%s1767_s28 + $0x58] sm:$0xff] %v852_v12 }
 0x2b5   : > { %v855_v14 = vpop.f32.mrb[12].mxu1 }
 0x2b6   : > { %v856_v15 = vadd.f32 %v855_v14, %v760_v13  ;;  %v857_v16 = vpop.f32.mrb[13].mxu1 }
 0x2b7   : > { %v858_v18 = vadd.f32 %v857_v16, %v760_v13  ;;  %v859_v19 = vpop.f32.mrb[14].mxu1 }
 0x2b8   : > { %876 = vst [vmem:[%s1767_s28 + $0x60] sm:$0xff] %v856_v15  ;;  %v860_v20 = vadd.f32 %v859_v19, %v765_v17  ;;  %v861_v21 = vpop.f32.mrb[15].mxu1 }
 0x2b9   : > { %877 = vst [vmem:[%s1767_s28 + $0x68] sm:$0xff] %v858_v18  ;;  %v862_v22 = vadd.f32 %v861_v21, %v765_v17 }
 0x2ba   : > { %878 = vst [vmem:[%s1767_s28 + $0x70] sm:$0xff] %v860_v20 }
 0x2bb   : > { %879 = vst [vmem:[%s1767_s28 + $0x78] sm:$0xff] %v862_v22 }
 0x2bc   : > { %1370 = shalt.err (!%p1367_p0)
}
 0x2bd   : > { %s1371_s15 = scalar_lea.hbm %s1787_s12, 2048  ;;  %s1375_s6 = scalar_lea.hbm %s1846_s5, 4096 }
 0x2be   : > { %p1372_p4 = scmp.ne.s32.totalorder %s1787_s12, %s1371_s15  ;;  %p1376_p12 = scmp.lt.u32.totalorder %s1787_s12, %s1846_s5 }
 0x2bf   : > { %p1377_p1 = scmp.lt.u32.totalorder %s1375_s6, %s1371_s15  ;;  %p1379_p11 = scmp.lt.u32.totalorder %s1371_s15, %s1787_s12 }
 0x2c0   : > { %p1373_p13 = pnand %p1372_p4, %p1670_p5 }
 0x2c1   : > { %p1378_p8 = por %p1377_p1, %p1376_p12 }
 0x2c2   : > { %p1374_p2 = pneg %p1373_p13 }
 0x2c3   : > { %p1380_p6 = por %p1379_p11, %p1378_p8 }
 0x2c5   : > { %p1381_p10 = pnand %p1380_p6, %p1374_p2 }
 0x2c7   : > { %1384 = shalt.err (!%p1381_p10)
}
 0x2c8   : > { %s1460_s28 = smov 256   ;;  %s1461_s30 = smov 16  }
 0x2c9   : > { %1097 = dma.vmem_to_hbm [thread:$0]  (%p1670_p5), %s1789_s10, 2048, %s1787_s12, %s881_s21, %s1460_s28, %s1460_s28, %s1461_s30  }
 0x2ca PF: > { %s1868_s11 = sld [smem:[#allocation16_spill]]  ;;  %s1869_s7 = sld [smem:[#allocation17_spill]] }
 0x2cb   : > { %p1871_p7 = scmp.ge.s32.totalorder %s1447_s23, 2 }
 0x2d0   : > { %s912_s13 = sand.u32 1, %s1868_s11   ;;  %p1870_p3 = scmp.ne.s32.totalorder %s1869_s7, 0 }
 0x2d1   : > { %s913_s18 = scalar_lea.sflag [#allocation4], %s912_s13 }
 0x2d2   : > { %p1117_p9 = pnand %p1871_p7, %p1870_p3 }
 0x2d4   : > { %1422 = dma.done.wait (!%p1117_p9), %s913_s18, 2048  }
 0x2d5   : > { %1424 = vsyncadd (!%p1117_p9), %s913_s18, 4294965248  ;;  %s23_s23 = sadd.s32 1, %s1447_s23   ;;  %s1872_s18 = smov %s1431_s19 }
 0x2d6   : > { %p20_p0 = scmp.ge.s32.totalorder %s23_s23, 4   ;;  %s1873_s19 = smov %s1435_s20 }
 0x2d7   : > { %s1874_s20 = smov %s1679_s25  ;;  %s1875_s21 = smov %s1443_s22 }
 0x2d8   : > { %s1876_s22 = smov %s1878_s24  ;;  %22 = sbr.rel (!%p20_p0) target bundleno = 8 (0x8), region = 101 }
 0x2df   :  { %918 = vsyncpa [#allocation3], 1 }
 0x2e0   :  { %920 = vsyncpa [#allocation3 + $0x1], 1 }
 0x2e1   :  { %921 = vsyncpa [#allocation6], 1 }
 0x2e2   :  { %922 = vsyncpa [#allocation9], 1 }
 0x2e3   :  { %923 = vsyncpa [#allocation4], 1 }
 0x2e4   :  { %925 = vsyncpa [#allocation4 + $0x1], 1 }

</bundles_post_ra>
